<compile_context>
chip_gen: v5e
topology: v5e:2x2
jax: 0.10.0
libtpu: 0.0.40
codegen_flags: <defaults>
</compile_context>

<pallas_src>
import functools

import jax
import jax.numpy as jnp
from jax.experimental import pallas as pl
from jax.experimental.pallas import tpu as pltpu


def _fc_kernel(x_ref, param_ref, sel_ref, red_ref, o_ref, *, wsize):
    # Per-grid-step blocks:
    #   x_ref:     (TB, num_in)
    #   param_ref: (TB, wsize + num_out)   flat per-example [weights | bias]
    #   sel_ref:   (num_in, wsize)   sel[k, c*num_in + k] = 1   (lane-tiles x)
    #   red_ref:   (wsize, num_out)  red[c*num_in + k, c] = 1   (segmented sum)
    #   o_ref:     (TB, num_out)
    x = x_ref[...].astype(jnp.float32)              # (TB, num_in)
    p = param_ref[...].astype(jnp.float32)          # (TB, wsize + num_out)
    w_flat = p[:, :wsize]                           # (TB, wsize) lane-dense weights
    bias = p[:, wsize:]                             # (TB, num_out)

    # Lane-tile x so lane j = c*num_in + k carries x[:, k]  (one cheap MXU pass).
    x_tiled = jnp.dot(
        x, sel_ref[...],
        preferred_element_type=jnp.float32,
        precision=jax.lax.Precision.HIGHEST,
    )                                               # (TB, wsize)

    prod = w_flat * x_tiled                         # full-lane VPU multiply

    # Segmented sum over each num_in-wide lane group (one cheap MXU pass).
    out = jnp.dot(
        prod, red_ref[...],
        preferred_element_type=jnp.float32,
        precision=jax.lax.Precision.HIGHEST,
    )                                               # (TB, num_out)

    o_ref[...] = (out + bias).astype(o_ref.dtype)


def fc_layer_pallas(x, param, num_in, num_out, *, block_batch=512):
    """Pallas implementation of FC_layer.forward(x, param)."""
    B = x.shape[0]
    wsize = num_out * num_in
    param_size = wsize + num_out
    assert x.shape == (B, num_in)
    assert param.shape == (B, param_size)

    # Tiny constant relayout matrices (stay resident in VMEM across grid steps).
    k = jnp.arange(num_in)
    j = jnp.arange(wsize)
    sel = (j[None, :] % num_in == k[:, None]).astype(jnp.float32)       # (num_in, wsize)
    red = (j[:, None] // num_in == jnp.arange(num_out)[None, :]).astype(jnp.float32)  # (wsize, num_out)

    tb = min(block_batch, B)                 # full-extent block when B is small
    grid = (pl.cdiv(B, tb),)

    grid_spec = pltpu.PrefetchScalarGridSpec(
        num_scalar_prefetch=0,
        grid=grid,
        in_specs=[
            pl.BlockSpec((tb, num_in), lambda i: (i, 0)),
            pl.BlockSpec((tb, param_size), lambda i: (i, 0)),
            pl.BlockSpec((num_in, wsize), lambda i: (0, 0)),
            pl.BlockSpec((wsize, num_out), lambda i: (0, 0)),
        ],
        out_specs=pl.BlockSpec((tb, num_out), lambda i: (i, 0)),
    )

    kernel = functools.partial(_fc_kernel, wsize=wsize)

    return pl.pallas_call(
        kernel,
        out_shape=jax.ShapeDtypeStruct((B, num_out), x.dtype),
        grid_spec=grid_spec,
        compiler_params=pltpu.CompilerParams(
            dimension_semantics=("parallel",),   # shards batch axis across TCs on v7x
        ),
    )(x, param, sel, red)


if __name__ == "__main__":
    # Small shapes consistent with the module's forward.
    B, num_in, num_out = 2, 16, 32
    param_size = num_out * num_in + num_out   # 544

    key = jax.random.PRNGKey(0)
    kx, kp = jax.random.split(key)
    x = jax.random.normal(kx, (B, num_in), dtype=jnp.float32)
    param = jax.random.normal(kp, (B, param_size), dtype=jnp.float32)

    out = fc_layer_pallas(x, param, num_in, num_out)
    out = jax.block_until_ready(out)

    # Pure-JAX reference for correctness.
    w_ref = param[:, : num_out * num_in].reshape(B, num_out, num_in)
    b_ref = param[:, num_out * num_in:].reshape(B, num_out)
    ref = jnp.einsum("ab,acb->ac", x, w_ref,
                     precision=jax.lax.Precision.HIGHEST) + b_ref

    assert out.shape == (B, num_out)
    assert jnp.allclose(out, ref, atol=1e-4, rtol=1e-4), float(jnp.max(jnp.abs(out - ref)))
    print("KERNEL_OK")
</pallas_src>

<mosaic_0001>
module attributes {stable_mosaic.version = 11 : i64} {
  func.func @_fc_kernel(%arg0: i32, %arg1: memref<2x16xf32, #tpu.memory_space<vmem>>, %arg2: memref<2x544xf32, #tpu.memory_space<vmem>>, %arg3: memref<16x512xf32, #tpu.memory_space<vmem>>, %arg4: memref<512x32xf32, #tpu.memory_space<vmem>>, %arg5: memref<2x32xf32, #tpu.memory_space<vmem>>) attributes {dimension_semantics = [#tpu.dimension_semantics<parallel>], iteration_bounds = array<i64: 1>, scalar_prefetch = 0 : i64, scratch_operands = 0 : i64, tpu.core_type = #tpu.core_type<tc>, window_params = [{transform_indices = @transform_0, window_bounds = array<i64: 2, 16>}, {transform_indices = @transform_1, window_bounds = array<i64: 2, 544>}, {pipeline_mode = #tpu.pipeline_mode<synchronous>, transform_indices = @transform_2, window_bounds = array<i64: 16, 512>}, {pipeline_mode = #tpu.pipeline_mode<synchronous>, transform_indices = @transform_3, window_bounds = array<i64: 512, 32>}, {transform_indices = @transform_4, window_bounds = array<i64: 2, 32>}]} {
    %c0 = arith.constant 0 : index
    %c0_0 = arith.constant 0 : index
    %0 = vector.load %arg1[%c0, %c0_0] : memref<2x16xf32, #tpu.memory_space<vmem>>, vector<2x16xf32>
    %c0_1 = arith.constant 0 : index
    %c0_2 = arith.constant 0 : index
    %1 = vector.load %arg2[%c0_1, %c0_2] : memref<2x544xf32, #tpu.memory_space<vmem>>, vector<2x544xf32>
    %2 = vector.extract_strided_slice %1 {offsets = [0, 0], sizes = [2, 512], strides = [1, 1]} : vector<2x544xf32> to vector<2x512xf32>
    %3 = vector.extract_strided_slice %1 {offsets = [0, 512], sizes = [2, 32], strides = [1, 1]} : vector<2x544xf32> to vector<2x32xf32>
    %c0_3 = arith.constant 0 : index
    %c0_4 = arith.constant 0 : index
    %4 = vector.load %arg3[%c0_3, %c0_4] : memref<16x512xf32, #tpu.memory_space<vmem>>, vector<16x512xf32>
    %cst = arith.constant dense<0.000000e+00> : vector<2x512xf32>
    %5 = tpu.matmul %0, %4, %cst {dimension_numbers = #tpu.dot_dimension_numbers<[1], [0], [0], [1], [0, 0, 1, 1], [], []>, precision = #tpu.contract_precision<fp32>} : vector<2x16xf32>, vector<16x512xf32>, vector<2x512xf32> -> vector<2x512xf32>
    %6 = arith.mulf %2, %5 : vector<2x512xf32>
    %c0_5 = arith.constant 0 : index
    %c0_6 = arith.constant 0 : index
    %7 = vector.load %arg4[%c0_5, %c0_6] : memref<512x32xf32, #tpu.memory_space<vmem>>, vector<512x32xf32>
    %cst_7 = arith.constant dense<0.000000e+00> : vector<2x32xf32>
    %8 = tpu.matmul %6, %7, %cst_7 {dimension_numbers = #tpu.dot_dimension_numbers<[1], [0], [0], [1], [0, 0, 1, 1], [], []>, precision = #tpu.contract_precision<fp32>} : vector<2x512xf32>, vector<512x32xf32>, vector<2x32xf32> -> vector<2x32xf32>
    %9 = arith.addf %8, %3 : vector<2x32xf32>
    %c0_8 = arith.constant 0 : index
    %c0_9 = arith.constant 0 : index
    %10 = vector.load %arg5[%c0_8, %c0_9] : memref<2x32xf32, #tpu.memory_space<vmem>>, vector<2x32xf32>
    tpu.vector_store %arg5[%c0_8, %c0_9], %9 {strides = array<i32>} : memref<2x32xf32, #tpu.memory_space<vmem>>, vector<2x32xf32>,
    return
  }
  func.func @transform_0(%arg0: i32) -> (i32, i32) {
    %c0_i32 = arith.constant 0 : i32
    %c0_i32_0 = arith.constant 0 : i32
    return %arg0, %c0_i32 : i32, i32
  }
  func.func @transform_1(%arg0: i32) -> (i32, i32) {
    %c0_i32 = arith.constant 0 : i32
    %c0_i32_0 = arith.constant 0 : i32
    return %arg0, %c0_i32 : i32, i32
  }
  func.func @transform_2(%arg0: i32) -> (i32, i32) {
    %c0_i32 = arith.constant 0 : i32
    %c0_i32_0 = arith.constant 0 : i32
    %c0_i32_1 = arith.constant 0 : i32
    return %c0_i32, %c0_i32_0 : i32, i32
  }
  func.func @transform_3(%arg0: i32) -> (i32, i32) {
    %c0_i32 = arith.constant 0 : i32
    %c0_i32_0 = arith.constant 0 : i32
    %c0_i32_1 = arith.constant 0 : i32
    return %c0_i32, %c0_i32_0 : i32, i32
  }
  func.func @transform_4(%arg0: i32) -> (i32, i32) {
    %c0_i32 = arith.constant 0 : i32
    %c0_i32_0 = arith.constant 0 : i32
    return %arg0, %c0_i32 : i32, i32
  }
}

</mosaic_0001>

<bundles_post_ra>
// kernel: tpu_custom_call.1
= control target key start
LH: loop header
LB: loop body
LE: loop exit
PB: predicated region body
PF: predicated region fallthrough
CT: control target
= control target key end

     0   :  { %vm29_vm0 = vcmask 130048   ;;  %s3531_s0 = inlined_call_operand.vmem [shape: f32[2,16], index: 0, kind: input, shape index: {}]   ;;  %s3532_s1 = inlined_call_operand.vmem [shape: f32[2,544], index: 1, kind: input, shape index: {}]   ;;  %s3533_s2 = inlined_call_operand.vmem [shape: f32[16,512], index: 2, kind: input, shape index: {}]   ;;  %s3534_s3 = inlined_call_operand.vmem [shape: f32[512,32], index: 3, kind: input, shape index: {}]   ;;  %s3535_s4 = inlined_call_operand.hbm [shape: f32[2,32], index: 4, kind: output, shape index: {}]  }
   0x1   :  { %v25_v0 = vld [vmem:[%s3533_s2 + $0x20] sm:$0xff]  ;;  %v26_v6 = vld [vmem:[%s3533_s2 + $0x28] sm:$0xff]  ;;  %v27_v11 = vld [vmem:[%s3533_s2 + $0x30] sm:$0xff] }
   0x2   :  { %v21_v1 = vld [vmem:[%s3533_s2] sm:$0xff]  ;;  %v47_v3 = vand.u32 4294901760, %v25_v0  ;;  %v22_v7 = vld [vmem:[%s3533_s2 + $0x8] sm:$0xff]  ;;  %v2212_v9 = vand.u32 4294901760, %v26_v6  ;;  %v28_v14 = vld [vmem:[%s3533_s2 + $0x38] sm:$0xff] }
   0x3   :  { %v18_v2 = vld [vmem:[%s3531_s0] sm:$0x3]  ;;  %v2202_v4 = vand.u32 4294901760, %v21_v1  ;;  %v2214_v10 = vand.u32 4294901760, %v22_v7 }
   0x4   :  { %v31_v5 = vsel %vm29_vm0, %v18_v2, 0  ;;  %v75_v12 = vsub.f32 %v25_v0, %v47_v3  ;;  %132 = vmatpush.msra.mxu3 %v47_v3  ;;  %48 = vmatpush.msra.mxu0 %v47_v3 }
   0x5   :  { %v2210_v8 = vand.u32 4294901760, %v31_v5  ;;  %v81_v13 = vsub.f32 %v21_v1, %v2202_v4 }
   0x6   :  { %9 = vsyncpa [#allocation3], 0  ;;  %v234_v16 = vsub.f32 %v26_v6, %v2212_v9  ;;  %v240_v17 = vsub.f32 %v22_v7, %v2214_v10  ;;  %v23_v18 = vld [vmem:[%s3533_s2 + $0x10] sm:$0xff]  ;;  %107 = vmatpush.msra.mxu2 %v75_v12  ;;  %134 = vmatpush.msra.mxu3 %v2202_v4  ;;  %v76_v19 = vand.u32 4294901760, %v75_v12  ;;  %v2232_v21 = vand.u32 4294901760, %v27_v11  ;;  %v24_v26 = vld [vmem:[%s3533_s2 + $0x18] sm:$0xff] }
   0x7   :  { %v2224_v15 = vsub.f32 %v31_v5, %v2210_v8  ;;  %v82_v20 = vand.u32 4294901760, %v81_v13  ;;  %50 = vmatpush.msra.mxu0 %v2202_v4  ;;  %v2238_v25 = vand.u32 4294901760, %v28_v14  ;;  %v2243_v29 = vand.u32 4294901760, %v23_v18  ;;  %v699_v55 = vld [vmem:[%s3534_s3 + $0x78] sm:$0xff]  ;;  %v698_v57 = vld [vmem:[%s3534_s3 + $0x70] sm:$0xff]  ;;  %v697_v60 = vld [vmem:[%s3534_s3 + $0x68] sm:$0xff] }
   0x8   :  { %v235_v23 = vand.u32 4294901760, %v234_v16  ;;  %v241_v24 = vand.u32 4294901760, %v240_v17  ;;  %110 = vmatpush.msra.mxu2 %v81_v13  ;;  %v77_v27 = vsub.f32 %v75_v12, %v76_v19  ;;  %v393_v35 = vsub.f32 %v27_v11, %v2232_v21  ;;  %v696_v0 = vld [vmem:[%s3534_s3 + $0x60] sm:$0xff]  ;;  %v695_v5 = vld [vmem:[%s3534_s3 + $0x58] sm:$0xff]  ;;  %v694_v11 = vld [vmem:[%s3534_s3 + $0x50] sm:$0xff]  ;;  %s2131_s26 = sshll.u32 %s3535_s4, 4  ;;  %s2132_s26 = int_to_ptr.hbm [resolvable:$true] %s2131_s26 }
   0x9   :  { %v2235_v22 = vand.u32 4294901760, %v2224_v15  ;;  %v83_v28 = vsub.f32 %v81_v13, %v82_v20  ;;  %159 = vmatpush.msrb.mxu0 %v76_v19  ;;  %113 = vmatmul.f32.vlgmr.msra.gmra.mxu2 %v2224_v15  ;;  %v2251_v36 = vand.u32 4294901760, %v24_v26  ;;  %v552_v40 = vsub.f32 %v28_v14, %v2238_v25 }
   0xa   :  { %v236_v31 = vsub.f32 %v234_v16, %v235_v23  ;;  %v242_v32 = vsub.f32 %v240_v17, %v241_v24  ;;  %v78_v33 = vand.u32 4294901760, %v77_v27  ;;  %207 = vmatpush.msrb.mxu2 %v2212_v9  ;;  %v399_v41 = vsub.f32 %v23_v18, %v2243_v29 }
   0xb   :  { %138 = vmatmul.f32.vlgmr.msra.gmra.mxu3 %v2235_v22  ;;  %v54_v30 = vsub.f32 %v2224_v15, %v2235_v22  ;;  %v84_v34 = vand.u32 4294901760, %v83_v28  ;;  %163 = vmatpush.msrb.mxu0 %v82_v20  ;;  %v394_v42 = vand.u32 4294901760, %v393_v35  ;;  %v558_v43 = vsub.f32 %v24_v26, %v2251_v36 }
   0xc   :  { %v237_v38 = vand.u32 4294901760, %v236_v31  ;;  %v243_v39 = vand.u32 4294901760, %v242_v32  ;;  %79 = vmatpush.msra.mxu1 %v78_v33  ;;  %209 = vmatpush.msrb.mxu2 %v2214_v10  ;;  %v553_v44 = vand.u32 4294901760, %v552_v40  ;;  %v400_v45 = vand.u32 4294901760, %v399_v41 }
   0xd   :  { %v2253_v37 = vand.u32 4294901760, %v54_v30  ;;  %v395_v46 = vsub.f32 %v393_v35, %v394_v42  ;;  %v559_v47 = vand.u32 4294901760, %v558_v43  ;;  %v2301_v56 = vand.u32 4294901760, %v699_v55 }
   0xe   :  { %238 = vmatpush.msrb.mxu3 %v237_v38  ;;  %85 = vmatpush.msra.mxu1 %v84_v34  ;;  %v554_v48 = vsub.f32 %v552_v40, %v553_v44  ;;  %v401_v49 = vsub.f32 %v399_v41, %v400_v45  ;;  %v2309_v59 = vand.u32 4294901760, %v698_v57  ;;  %v2321_v63 = vand.u32 4294901760, %v697_v60 }
   0xf   :  { %56 = vmatmul.f32.vlgmr.msra.gmra.mxu0 %v2253_v37  ;;  %318 = vmatpush.msra.mxu2 %v235_v23  ;;  %v396_v50 = vand.u32 4294901760, %v395_v46  ;;  %v560_v51 = vsub.f32 %v558_v43, %v559_v47  ;;  %v2307_v58 = vsub.f32 %v699_v55, %v2301_v56  ;;  %v692_v23 = vld [vmem:[%s3534_s3 + $0x40] sm:$0xff]  ;;  %vm676_vm1 = vcmask 1041408  }
  0x10   :  { %87 = vmatmul.f32.vlgmr.msra.gmra.mxu1 %v2210_v8  ;;  %244 = vmatpush.msrb.mxu3 %v243_v39  ;;  %v555_v52 = vand.u32 4294901760, %v554_v48  ;;  %v402_v53 = vand.u32 4294901760, %v401_v49  ;;  %v2318_v62 = vsub.f32 %v698_v57, %v2309_v59  ;;  %v2391_v27 = vand.u32 4294901760, %v692_v23 }
  0x11   :  { %184 = vmatpush.msrb.mxu1 %v47_v3  ;;  %215 = vmatmul.f32.vlgmr.msrb.gmra.mxu2 %v2253_v37  ;;  %v561_v54 = vand.u32 4294901760, %v560_v51  ;;  %v801_v61 = vand.u32 4294901760, %v2307_v58  ;;  %v2333_v3 = vsub.f32 %v697_v60, %v2321_v63  ;;  %vm678_vm2 = vcmask 1045508  }
  0x12   :  { %343 = vmatpush.msra.mxu3 %v2212_v9  ;;  %266 = vmatpush.msra.mxu0 %v234_v16  ;;  %v807_v2 = vand.u32 4294901760, %v2318_v62  ;;  %v2407_v32 = vsub.f32 %v692_v23, %v2391_v27  ;;  %vm680_vm3 = vcmask 1043456   ;;  %vm2122_vm4 = vcmask 254976  }
  0x13   :  { %246 = vmatmul.f32.vlgmr.msrb.gmra.mxu3 %v2210_v8  ;;  %186 = vmatpush.msrb.mxu1 %v2202_v4  ;;  %v802_v1 = vsub.f32 %v2307_v58, %v801_v61  ;;  %v2336_v4 = vand.u32 4294901760, %v696_v0 }
  0x14   :  { %322 = vmatpush.msra.mxu2 %v241_v24  ;;  %345 = vmatpush.msra.mxu3 %v2214_v10  ;;  %v808_v7 = vsub.f32 %v2318_v62, %v807_v2  ;;  %v843_v38 = vand.u32 4294901760, %v2407_v32 }
  0x15   :  { %269 = vmatpush.msra.mxu0 %v240_v17  ;;  %291 = vmatpush.msra.mxu1 %v2212_v9  ;;  %v803_v6 = vand.u32 4294901760, %v802_v1  ;;  %v2348_v9 = vsub.f32 %v696_v0, %v2336_v4  ;;  %v693_v17 = vld [vmem:[%s3534_s3 + $0x48] sm:$0xff]  ;;  %v686_v1 = vld [vmem:[%s3534_s3 + $0x10] sm:$0xff] }
  0x16   :  { %425 = vmatpush.msrb.mxu2 %v393_v35  ;;  %450 = vmatpush.msrb.mxu3 %v2232_v21  ;;  %v809_v12 = vand.u32 4294901760, %v808_v7  ;;  %v690_v35 = vld [vmem:[%s3534_s3 + $0x30] sm:$0xff] }
  0x17   :  { %165 = vmatmul.f32.vlgmr.msrb.gmra.mxu0 %v2210_v8  ;;  %293 = vmatpush.msra.mxu1 %v2214_v10  ;;  %v2352_v10 = vand.u32 4294901760, %v695_v5  ;;  %v819_v14 = vand.u32 4294901760, %v2348_v9 }
  0x18   :  { %188 = vmatmul.f32.vlgmr.msrb.gmra.mxu1 %v2210_v8  ;;  %366 = vmatpush.msrb.mxu0 %v2232_v21 }
  0x19   :  { %428 = vmatpush.msrb.mxu2 %v399_v41  ;;  %452 = vmatpush.msrb.mxu3 %v2243_v29  ;;  %v2366_v16 = vsub.f32 %v695_v5, %v2352_v10  ;;  %v820_v19 = vsub.f32 %v2348_v9, %v819_v14  ;;  %v689_v41 = vld [vmem:[%s3534_s3 + $0x28] sm:$0xff] }
  0x1a   :  { %324 = vmatmul.f32.vlgmr.msra.gmra.mxu2 %v2210_v8  ;;  %368 = vmatpush.msrb.mxu0 %v2243_v29 }
  0x1b   :  { %347 = vmatmul.f32.vlgmr.msra.gmra.mxu3 %v2210_v8  ;;  %397 = vmatpush.msrb.mxu1 %v396_v50  ;;  %v821_v24 = vand.u32 4294901760, %v820_v19 }
  0x1c   :  { %525 = vmatpush.msra.mxu2 %v2238_v25  ;;  %556 = vmatpush.msra.mxu3 %v555_v52 }
  0x1d   :  { %403 = vmatpush.msrb.mxu1 %v402_v53  ;;  %v687_v53 = vld [vmem:[%s3534_s3 + $0x18] sm:$0xff] }
  0x1e   :  { %527 = vmatpush.msra.mxu2 %v2251_v36  ;;  %562 = vmatpush.msra.mxu3 %v561_v54  ;;  %v2465_v60 = vand.u32 4294901760, %v687_v53 }
  0x1f   :  { %272 = vmatmul.f32.vlgmr.msra.gmra.mxu0 %v2224_v15 }
  0x20   :  { %477 = vmatpush.msra.mxu0 %v394_v42  ;;  %297 = vmatmul.f32.vlgmr.msra.gmra.mxu1 %v2235_v22  ;;  %v2481_v7 = vsub.f32 %v687_v53, %v2465_v60 }
  0x21   :  { %502 = vmatpush.msra.mxu1 %v2232_v21  ;;  %v2379_v21 = vand.u32 4294901760, %v693_v17 }
  0x22   :  { %481 = vmatpush.msra.mxu0 %v400_v45  ;;  %431 = vmatmul.f32.vlgmr.msrb.gmra.mxu2 %v2224_v15  ;;  %v2435_v45 = vand.u32 4294901760, %v689_v41  ;;  %v873_v19 = vand.u32 4294901760, %v2481_v7 }
  0x23   :  { %456 = vmatmul.f32.vlgmr.msrb.gmra.mxu3 %v2235_v22  ;;  %504 = vmatpush.msra.mxu1 %v2243_v29  ;;  %v2389_v26 = vsub.f32 %v693_v17, %v2379_v21  ;;  %v691_v29 = vld [vmem:[%s3534_s3 + $0x38] sm:$0xff] }
  0x24   :  { %636 = vmatpush.msrb.mxu2 %v553_v44  ;;  %661 = vmatpush.msrb.mxu3 %v2238_v25  ;;  %v2409_v33 = vand.u32 4294901760, %v691_v29  ;;  %v2450_v50 = vsub.f32 %v689_v41, %v2435_v45 }
  0x25   :  { %v837_v31 = vand.u32 4294901760, %v2389_v26 }
  0x26   :  { %640 = vmatpush.msrb.mxu2 %v559_v47  ;;  %663 = vmatpush.msrb.mxu3 %v2251_v36  ;;  %v2422_v39 = vsub.f32 %v691_v29, %v2409_v33  ;;  %v688_v47 = vld [vmem:[%s3534_s3 + $0x20] sm:$0xff]  ;;  %v861_v55 = vand.u32 4294901760, %v2450_v50 }
  0x27   :  { %374 = vmatmul.f32.vlgmr.msrb.gmra.mxu0 %v2253_v37  ;;  %v2452_v51 = vand.u32 4294901760, %v688_v47 }
  0x28   :  { %584 = vmatpush.msrb.mxu0 %v552_v40  ;;  %405 = vmatmul.f32.vlgmr.msrb.gmra.mxu1 %v2210_v8  ;;  %v2426_v40 = vand.u32 4294901760, %v690_v35  ;;  %v849_v44 = vand.u32 4294901760, %v2422_v39  ;;  %v862_v5 = vsub.f32 %v2450_v50, %v861_v55 }
  0x29   :  { %609 = vmatpush.msrb.mxu1 %v2238_v25  ;;  %v2463_v57 = vsub.f32 %v688_v47, %v2452_v51 }
  0x2a   :  { %587 = vmatpush.msrb.mxu0 %v558_v43  ;;  %533 = vmatmul.f32.vlgmr.msra.gmra.mxu2 %v2253_v37  ;;  %v838_v37 = vsub.f32 %v2389_v26, %v837_v31  ;;  %v844_v43 = vsub.f32 %v2407_v32, %v843_v38  ;;  %v2440_v46 = vsub.f32 %v690_v35, %v2426_v40  ;;  %v863_v17 = vand.u32 4294901760, %v862_v5 }
  0x2b   :  { %564 = vmatmul.f32.vlgmr.msra.gmra.mxu3 %v2210_v8  ;;  %611 = vmatpush.msrb.mxu1 %v2251_v36  ;;  %v850_v49 = vsub.f32 %v2422_v39, %v849_v44 }
  0x2c   :  { %955 = vmatpush.msra.mxu3 %v2301_v56  ;;  %902 = vmatpush.msra.mxu2 %v2307_v58  ;;  %v839_v42 = vand.u32 4294901760, %v838_v37  ;;  %v845_v48 = vand.u32 4294901760, %v844_v43  ;;  %v855_v52 = vand.u32 4294901760, %v2440_v46 }
  0x2d   :  { %v851_v54 = vand.u32 4294901760, %v850_v49  ;;  %v715_v49 = vld [vmem:[%s3534_s3 + $0xf8] sm:$0xff] }
  0x2e   :  { %957 = vmatpush.msra.mxu3 %v2309_v59  ;;  %905 = vmatpush.msra.mxu2 %v2318_v62  ;;  %v856_v0 = vsub.f32 %v2440_v46, %v855_v52 }
  0x2f   :  { %483 = vmatmul.f32.vlgmr.msra.gmra.mxu0 %v2210_v8 }
  0x30   :  { %506 = vmatmul.f32.vlgmr.msra.gmra.mxu1 %v2210_v8  ;;  %759 = vmatpush.msra.mxu0 %v2301_v56 }
  0x31   :  { %959 = vmatpush.msra.mxu3 %v2321_v63  ;;  %908 = vmatpush.msra.mxu2 %v2333_v3 }
  0x32   :  { %642 = vmatmul.f32.vlgmr.msrb.gmra.mxu2 %v2210_v8  ;;  %761 = vmatpush.msra.mxu0 %v2309_v59 }
  0x33   :  { %665 = vmatmul.f32.vlgmr.msrb.gmra.mxu3 %v2210_v8  ;;  %v813_v8 = vand.u32 4294901760, %v2333_v3  ;;  %804 = vmatpush.msra.mxu1 %v803_v6  ;;  %v867_v6 = vand.u32 4294901760, %v2463_v57 }
  0x34   :  { %763 = vmatpush.msra.mxu0 %v2321_v63  ;;  %961 = vmatpush.msra.mxu3 %v2336_v4 }
  0x35   :  { %v814_v13 = vsub.f32 %v2333_v3, %v813_v8  ;;  %911 = vmatpush.msra.mxu2 %v2348_v9  ;;  %810 = vmatpush.msra.mxu1 %v809_v12  ;;  %v857_v12 = vand.u32 4294901760, %v856_v0  ;;  %v710_v9 = vld [vmem:[%s3534_s3 + $0xd0] sm:$0xff] }
  0x36   :  { %765 = vmatpush.msra.mxu0 %v2336_v4  ;;  %963 = vmatpush.msra.mxu3 %v2352_v10 }
  0x37   :  { %590 = vmatmul.f32.vlgmr.msrb.gmra.mxu0 %v2224_v15  ;;  %v2363_v15 = vand.u32 4294901760, %v694_v11  ;;  %v815_v18 = vand.u32 4294901760, %v814_v13  ;;  %914 = vmatpush.msra.mxu2 %v2366_v16  ;;  %v685_v13 = vld [vmem:[%s3534_s3 + $0x8] sm:$0xff] }
  0x38   :  { %615 = vmatmul.f32.vlgmr.msrb.gmra.mxu1 %v2235_v22  ;;  %767 = vmatpush.msra.mxu0 %v2352_v10  ;;  %v825_v22 = vand.u32 4294901760, %v2366_v16 }
  0x39   :  { %v2377_v20 = vsub.f32 %v694_v11, %v2363_v15  ;;  %965 = vmatpush.msra.mxu3 %v2363_v15  ;;  %816 = vmatpush.msra.mxu1 %v815_v18  ;;  %v2483_v11 = vand.u32 4294901760, %v686_v1  ;;  %v868_v18 = vsub.f32 %v2463_v57, %v867_v6 }
  0x3a   :  { %769 = vmatpush.msra.mxu0 %v2363_v15  ;;  %v826_v28 = vsub.f32 %v2366_v16, %v825_v22  ;;  %v709_v16 = vld [vmem:[%s3534_s3 + $0xc8] sm:$0xff] }
  0x3b   :  { %v831_v25 = vand.u32 4294901760, %v2377_v20  ;;  %917 = vmatpush.msra.mxu2 %v2377_v20  ;;  %967 = vmatpush.msra.mxu3 %v2379_v21  ;;  %v2496_v23 = vsub.f32 %v686_v1, %v2483_v11  ;;  %v869_v29 = vand.u32 4294901760, %v868_v18  ;;  %v714_v1 = vld [vmem:[%s3534_s3 + $0xf0] sm:$0xff]  ;;  %v713_v18 = vld [vmem:[%s3534_s3 + $0xe8] sm:$0xff] }
  0x3c   :  { %822 = vmatpush.msra.mxu1 %v821_v24  ;;  %771 = vmatpush.msra.mxu0 %v2379_v21  ;;  %v827_v34 = vand.u32 4294901760, %v826_v28  ;;  %v2501_v24 = vand.u32 4294901760, %v685_v13  ;;  %v684_v28 = vld [vmem:[%s3534_s3] sm:$0xff] }
  0x3d   :  { %v832_v30 = vsub.f32 %v2377_v20, %v831_v25  ;;  %920 = vmatpush.msra.mxu2 %v2389_v26  ;;  %969 = vmatpush.msra.mxu3 %v2391_v27  ;;  %v2510_v35 = vand.u32 4294901760, %v684_v28 }
  0x3e   :  { %773 = vmatpush.msra.mxu0 %v2391_v27  ;;  %828 = vmatpush.msra.mxu1 %v827_v34  ;;  %v879_v34 = vand.u32 4294901760, %v2496_v23 }
  0x3f   :  { %v833_v36 = vand.u32 4294901760, %v832_v30  ;;  %923 = vmatpush.msra.mxu2 %v2407_v32  ;;  %971 = vmatpush.msra.mxu3 %v2409_v33  ;;  %v874_v30 = vsub.f32 %v2481_v7, %v873_v19  ;;  %v706_v32 = vld [vmem:[%s3534_s3 + $0xb0] sm:$0xff] }
  0x40   :  { %775 = vmatpush.msra.mxu0 %v2409_v33  ;;  %v880_v41 = vsub.f32 %v2496_v23, %v879_v34 }
  0x41   :  { %834 = vmatpush.msra.mxu1 %v833_v36  ;;  %926 = vmatpush.msra.mxu2 %v2422_v39  ;;  %v2515_v36 = vsub.f32 %v685_v13, %v2501_v24  ;;  %v875_v37 = vand.u32 4294901760, %v874_v30  ;;  %v2552_v13 = vand.u32 4294901760, %v714_v1  ;;  %v712_v30 = vld [vmem:[%s3534_s3 + $0xe0] sm:$0xff] }
  0x42   :  { %973 = vmatpush.msra.mxu3 %v2426_v40  ;;  %777 = vmatpush.msra.mxu0 %v2426_v40  ;;  %v881_v47 = vand.u32 4294901760, %v880_v41 }
  0x43   :  { %840 = vmatpush.msra.mxu1 %v839_v42  ;;  %929 = vmatpush.msra.mxu2 %v2440_v46  ;;  %v2522_v42 = vsub.f32 %v684_v28, %v2510_v35  ;;  %v885_v43 = vand.u32 4294901760, %v2515_v36 }
  0x44   :  { %975 = vmatpush.msra.mxu3 %v2435_v45  ;;  %779 = vmatpush.msra.mxu0 %v2435_v45 }
  0x45   :  { %846 = vmatpush.msra.mxu1 %v845_v48  ;;  %932 = vmatpush.msra.mxu2 %v2450_v50  ;;  %v3546_v48 = vand.u32 4294901760, %v2522_v42  ;;  %v886_v53 = vsub.f32 %v2515_v36, %v885_v43 }
  0x46   :  { %977 = vmatpush.msra.mxu3 %v2452_v51  ;;  %781 = vmatpush.msra.mxu0 %v2452_v51 }
  0x47   :  { %852 = vmatpush.msra.mxu1 %v851_v54  ;;  %935 = vmatpush.msra.mxu2 %v2463_v57  ;;  %v2538_v54 = vand.u32 4294901760, %v715_v49  ;;  %v892_v0 = vsub.f32 %v2522_v42, %v3546_v48  ;;  %v887_v5 = vand.u32 4294901760, %v886_v53  ;;  %v701_v57 = vld [vmem:[%s3534_s3 + $0x88] sm:$0xff] }
  0x48   :  { %979 = vmatpush.msra.mxu3 %v2465_v60  ;;  %783 = vmatpush.msra.mxu0 %v2465_v60 }
  0x49   :  { %858 = vmatpush.msra.mxu1 %v857_v12  ;;  %938 = vmatpush.msra.mxu2 %v2481_v7  ;;  %v2550_v12 = vsub.f32 %v715_v49, %v2538_v54  ;;  %v2772_v7 = vand.u32 4294901760, %v701_v57 }
  0x4a   :  { %981 = vmatpush.msra.mxu3 %v2483_v11  ;;  %785 = vmatpush.msra.mxu0 %v2483_v11 }
  0x4b   :  { %864 = vmatpush.msra.mxu1 %v863_v17  ;;  %941 = vmatpush.msra.mxu2 %v2496_v23  ;;  %v893_v17 = vand.u32 4294901760, %v892_v0  ;;  %v3543_v58 = vand.u32 4294901760, %v2550_v12 }
  0x4c   :  { %983 = vmatpush.msra.mxu3 %v2501_v24  ;;  %787 = vmatpush.msra.mxu0 %v2501_v24 }
  0x4d   :  { %870 = vmatpush.msra.mxu1 %v869_v29  ;;  %944 = vmatpush.msra.mxu2 %v2515_v36  ;;  %v2566_v29 = vsub.f32 %v714_v1, %v2552_v13  ;;  %v3577_v36 = vand.u32 4294901760, %v2522_v42 }
  0x4e   :  { %985 = vmatpush.msra.mxu3 %v2510_v35  ;;  %789 = vmatpush.msra.mxu0 %v2510_v35 }
  0x4f   :  { %876 = vmatpush.msra.mxu1 %v875_v37  ;;  %947 = vmatpush.msra.mxu2 %v2522_v42  ;;  %v1143_v37 = vsub.f32 %v2550_v12, %v3543_v58  ;;  %v3541_v41 = vand.u32 4294901760, %v2566_v29  ;;  %v703_v58 = vld [vmem:[%s3534_s3 + $0x98] sm:$0xff] }
  0x50   :  { %996 = vmatpush.msrb.mxu0 %v801_v61  ;;  %v2563_v61 = vand.u32 4294901760, %v713_v18 }
  0x51   :  { %882 = vmatpush.msra.mxu1 %v881_v47  ;;  %1100 = vmatpush.msrb.mxu2 %v2538_v54  ;;  %v2582_v47 = vand.u32 4294901760, %v712_v30  ;;  %v1144_v53 = vand.u32 4294901760, %v1143_v37  ;;  %v1149_v0 = vsub.f32 %v2566_v29, %v3541_v41 }
  0x52   :  { %1000 = vmatpush.msrb.mxu0 %v807_v2  ;;  %v2585_v49 = vsub.f32 %v713_v18, %v2563_v61  ;;  %v2615_v18 = vand.u32 4294901760, %v710_v9 }
  0x53   :  { %888 = vmatpush.msra.mxu1 %v887_v5  ;;  %1102 = vmatpush.msrb.mxu2 %v2552_v13 }
  0x54   :  { %1004 = vmatpush.msrb.mxu0 %v813_v8  ;;  %v711_v8 = vld [vmem:[%s3534_s3 + $0xd8] sm:$0xff]  ;;  %v3538_v1 = vand.u32 4294901760, %v2585_v49  ;;  %1145 = vmatpush.msrb.mxu3 %v1144_v53  ;;  %v2631_v53 = vand.u32 4294901760, %v709_v16 }
  0x55   :  { %894 = vmatpush.msra.mxu1 %v893_v17  ;;  %1104 = vmatpush.msrb.mxu2 %v2563_v61  ;;  %v2600_v5 = vand.u32 4294901760, %v711_v8 }
  0x56   :  { %1008 = vmatpush.msrb.mxu0 %v819_v14  ;;  %v1150_v14 = vand.u32 4294901760, %v1149_v0  ;;  %v1155_v17 = vsub.f32 %v2585_v49, %v3538_v1 }
  0x57   :  { %1063 = vmatpush.msrb.mxu1 %v2301_v56  ;;  %1106 = vmatpush.msrb.mxu2 %v2582_v47  ;;  %v2604_v56 = vsub.f32 %v712_v30, %v2582_v47 }
  0x58   :  { %1012 = vmatpush.msrb.mxu0 %v825_v22  ;;  %1151 = vmatpush.msrb.mxu3 %v1150_v14  ;;  %v1156_v37 = vand.u32 4294901760, %v1155_v17 }
  0x59   :  { %1065 = vmatpush.msrb.mxu1 %v2309_v59  ;;  %1108 = vmatpush.msrb.mxu2 %v2600_v5  ;;  %v2618_v59 = vsub.f32 %v711_v8, %v2600_v5  ;;  %v3536_v30 = vand.u32 4294901760, %v2604_v56 }
  0x5a   :  { %1016 = vmatpush.msrb.mxu0 %v831_v25  ;;  %v708_v25 = vld [vmem:[%s3534_s3 + $0xc0] sm:$0xff]  ;;  %1157 = vmatpush.msrb.mxu3 %v1156_v37  ;;  %v707_v37 = vld [vmem:[%s3534_s3 + $0xb8] sm:$0xff] }
  0x5b   :  { %1067 = vmatpush.msrb.mxu1 %v2321_v63  ;;  %1110 = vmatpush.msrb.mxu2 %v2615_v18  ;;  %v3537_v8 = vand.u32 4294901760, %v2618_v59  ;;  %v2634_v63 = vsub.f32 %v710_v9, %v2615_v18  ;;  %v1161_v20 = vsub.f32 %v2604_v56, %v3536_v30  ;;  %v2654_v17 = vand.u32 4294901760, %v708_v25 }
  0x5c   :  { %1020 = vmatpush.msrb.mxu0 %v837_v31  ;;  %v2657_v30 = vsub.f32 %v709_v16, %v2631_v53 }
  0x5d   :  { %1069 = vmatpush.msrb.mxu1 %v2336_v4  ;;  %v1167_v4 = vsub.f32 %v2618_v59, %v3537_v8  ;;  %1112 = vmatpush.msrb.mxu2 %v2631_v53  ;;  %v3539_v9 = vand.u32 4294901760, %v2634_v63  ;;  %v1162_v31 = vand.u32 4294901760, %v1161_v20  ;;  %v2676_v20 = vsub.f32 %v708_v25, %v2654_v17 }
  0x5e   :  { %1024 = vmatpush.msrb.mxu0 %v843_v38  ;;  %v3540_v16 = vand.u32 4294901760, %v2657_v30 }
  0x5f   :  { %1071 = vmatpush.msrb.mxu1 %v2352_v10  ;;  %v1168_v8 = vand.u32 4294901760, %v1167_v4  ;;  %v1173_v1 = vsub.f32 %v2634_v63, %v3539_v9  ;;  %1114 = vmatpush.msrb.mxu2 %v2654_v17  ;;  %v2673_v10 = vand.u32 4294901760, %v707_v37  ;;  %v2684_v9 = vand.u32 4294901760, %v706_v32 }
  0x60   :  { %1163 = vmatpush.msrb.mxu3 %v1162_v31  ;;  %v1179_v4 = vsub.f32 %v2657_v30, %v3540_v16  ;;  %1028 = vmatpush.msrb.mxu0 %v849_v44 }
  0x61   :  { %1073 = vmatpush.msrb.mxu1 %v2363_v15  ;;  %v1174_v38 = vand.u32 4294901760, %v1173_v1  ;;  %v3542_v15 = vand.u32 4294901760, %v2676_v20  ;;  %v2691_v25 = vsub.f32 %v707_v37, %v2673_v10  ;;  %v705_v1 = vld [vmem:[%s3534_s3 + $0xa8] sm:$0xff]  ;;  %1116 = vmatpush.msrb.mxu2 %v2673_v10  ;;  %v2702_v39 = vsub.f32 %v706_v32, %v2684_v9 }
  0x62   :  { %1169 = vmatpush.msrb.mxu3 %v1168_v8  ;;  %v1180_v16 = vand.u32 4294901760, %v1179_v4  ;;  %v2699_v41 = vand.u32 4294901760, %v705_v1  ;;  %1032 = vmatpush.msrb.mxu0 %v855_v52  ;;  %v704_v8 = vld [vmem:[%s3534_s3 + $0xa0] sm:$0xff] }
  0x63   :  { %1075 = vmatpush.msrb.mxu1 %v2379_v21  ;;  %v1185_v21 = vsub.f32 %v2676_v20, %v3542_v15  ;;  %v3544_v44 = vand.u32 4294901760, %v2691_v25  ;;  %1118 = vmatpush.msrb.mxu2 %v2684_v9  ;;  %v3545_v46 = vand.u32 4294901760, %v2702_v39 }
  0x64   :  { %1175 = vmatpush.msrb.mxu3 %v1174_v38  ;;  %v2723_v52 = vsub.f32 %v705_v1, %v2699_v41  ;;  %1036 = vmatpush.msrb.mxu0 %v861_v55  ;;  %v2741_v1 = vand.u32 4294901760, %v703_v58 }
  0x65   :  { %1077 = vmatpush.msrb.mxu1 %v2391_v27  ;;  %v2720_v27 = vand.u32 4294901760, %v704_v8  ;;  %v1186_v4 = vand.u32 4294901760, %v1185_v21  ;;  %v1191_v15 = vsub.f32 %v2691_v25, %v3544_v44  ;;  %1120 = vmatpush.msrb.mxu2 %v2699_v41  ;;  %v1197_v50 = vsub.f32 %v2702_v39, %v3545_v46  ;;  %v702_v21 = vld [vmem:[%s3534_s3 + $0x90] sm:$0xff] }
  0x66   :  { %1181 = vmatpush.msrb.mxu3 %v1180_v16  ;;  %v1202_v55 = vand.u32 4294901760, %v2723_v52  ;;  %1040 = vmatpush.msrb.mxu0 %v867_v6  ;;  %v2757_v48 = vand.u32 4294901760, %v702_v21 }
  0x67   :  { %1079 = vmatpush.msrb.mxu1 %v2409_v33  ;;  %v2744_v33 = vsub.f32 %v704_v8, %v2720_v27  ;;  %v1192_v16 = vand.u32 4294901760, %v1191_v15  ;;  %v1198_v44 = vand.u32 4294901760, %v1197_v50  ;;  %1122 = vmatpush.msrb.mxu2 %v2720_v27 }
  0x68   :  { %1187 = vmatpush.msrb.mxu3 %v1186_v4  ;;  %v1203_v46 = vsub.f32 %v2723_v52, %v1202_v55  ;;  %1044 = vmatpush.msrb.mxu0 %v873_v19 }
  0x69   :  { %1081 = vmatpush.msrb.mxu1 %v2426_v40  ;;  %v3548_v8 = vand.u32 4294901760, %v2744_v33  ;;  %v2763_v40 = vsub.f32 %v703_v58, %v2741_v1  ;;  %1124 = vmatpush.msrb.mxu2 %v2741_v1 }
  0x6a   :  { %1193 = vmatpush.msrb.mxu3 %v1192_v16  ;;  %v1204_v15 = vand.u32 4294901760, %v1203_v46  ;;  %1048 = vmatpush.msrb.mxu0 %v879_v34 }
  0x6b   :  { %1083 = vmatpush.msrb.mxu1 %v2435_v45  ;;  %v1209_v4 = vsub.f32 %v2744_v33, %v3548_v8  ;;  %v2775_v45 = vsub.f32 %v702_v21, %v2757_v48  ;;  %v3547_v19 = vand.u32 4294901760, %v2763_v40  ;;  %1126 = vmatpush.msrb.mxu2 %v2757_v48  ;;  %v700_v21 = vld [vmem:[%s3534_s3 + $0x80] sm:$0xff] }
  0x6c   :  { %1199 = vmatpush.msrb.mxu3 %v1198_v44  ;;  %1052 = vmatpush.msrb.mxu0 %v885_v43  ;;  %v2792_v34 = vand.u32 4294901760, %v700_v21 }
  0x6d   :  { %1085 = vmatpush.msrb.mxu1 %v2452_v51  ;;  %v1210_v50 = vand.u32 4294901760, %v1209_v4  ;;  %v3549_v16 = vand.u32 4294901760, %v2775_v45  ;;  %v1215_v51 = vsub.f32 %v2763_v40, %v3547_v19  ;;  %1128 = vmatpush.msrb.mxu2 %v2772_v7  ;;  %v2799_v4 = vsub.f32 %v701_v57, %v2772_v7 }
  0x6e   :  { %1205 = vmatpush.msrb.mxu3 %v1204_v15  ;;  %1056 = vmatpush.msrb.mxu0 %v3577_v36  ;;  %v2807_v19 = vsub.f32 %v700_v21, %v2792_v34 }
  0x6f   :  { %1087 = vmatpush.msrb.mxu1 %v2465_v60  ;;  %v1221_v44 = vsub.f32 %v2775_v45, %v3549_v16  ;;  %v1216_v15 = vand.u32 4294901760, %v1215_v51  ;;  %1130 = vmatpush.msrb.mxu2 %v2792_v34  ;;  %v1226_v57 = vand.u32 4294901760, %v2799_v4 }
  0x70   :  { %1211 = vmatpush.msrb.mxu3 %v1210_v50  ;;  %v3550_v42 = vand.u32 4294901760, %v2807_v19 }
  0x71   :  { %1089 = vmatpush.msrb.mxu1 %v2483_v11  ;;  %v1222_v8 = vand.u32 4294901760, %v1221_v44  ;;  %v1227_v11 = vsub.f32 %v2799_v4, %v1226_v57 }
  0x72   :  { %1217 = vmatpush.msrb.mxu3 %v1216_v15 }
  0x73   :  { %1091 = vmatpush.msrb.mxu1 %v2501_v24  ;;  %v1228_v50 = vand.u32 4294901760, %v1227_v11 }
  0x74   :  { %1223 = vmatpush.msrb.mxu3 %v1222_v8 }
  0x75   :  { %1093 = vmatpush.msrb.mxu1 %v2510_v35 }
  0x76   :  { %1229 = vmatpush.msrb.mxu3 %v1228_v50 }
  0x8c   :  { %v2559_v28 = vpop.f32.mrf.mxu0  ;;  %v2575_v2 = vpop.f32.mrf.mxu2 }
  0x8d   :  { %v2573_v62 = vpop.f32.mrf.mxu1 }
  0x8e   :  { %v2587_v3 = vpop.f32.mrf.mxu3 }
  0x94   :  { %v2627_v22 = vpop.f32.mrf.mxu0  ;;  %v2647_v14 = vpop.f32.mrf.mxu2 }
  0x95   :  { %v2645_v0 = vpop.f32.mrf.mxu1 }
  0x96   :  { %v2659_v26 = vpop.f32.mrf.mxu3 }
  0x97   :  { %v248_v60 = vadd.f32 %v2659_v26, %v2647_v14  ;;  %v89_v26 = vadd.f32 %v2573_v62, %v2559_v28 }
  0x99   :  { %v115_v36 = vadd.f32 %v2575_v2, %v89_v26 }
  0x9b   :  { %v140_v8 = vadd.f32 %v2587_v3, %v115_v36 }
  0x9c   :  { %v2696_v31 = vpop.f32.mrf.mxu0 }
  0x9d   :  { %v2714_v37 = vpop.f32.mrf.mxu1  ;;  %v2716_v32 = vpop.f32.mrf.mxu2  ;;  %v274_v16 = vadd.f32 %v2696_v31, %v248_v60  ;;  %v1233_v31 = vsub.f32 %v2807_v19, %v3550_v42 }
  0x9e   :  { %v2727_v38 = vpop.f32.mrf.mxu3 }
  0x9f   :  { %v299_v21 = vadd.f32 %v2714_v37, %v274_v16  ;;  %v1234_v51 = vand.u32 4294901760, %v1233_v31  ;;  %v167_v31 = vadd.f32 %v2627_v22, %v140_v8  ;;  %v3579_v8 = vand.u32 4294901760, %v2566_v29 }
  0xa1   :  { %1235 = vmatpush.msrb.mxu3 %v1234_v51  ;;  %v326_v28 = vadd.f32 %v2716_v32, %v299_v21  ;;  %v190_v32 = vadd.f32 %v2645_v0, %v167_v31 }
  0xa3   :  { %v349_v11 = vadd.f32 %v2727_v38, %v326_v28 }
  0xa4   :  { %v375_v6 = vpop.f32.mrf.mxu0 }
  0xa5   :  { %v406_v58 = vpop.f32.mrf.mxu1  ;;  %v432_v46 = vpop.f32.mrf.mxu2 }
  0xa6   :  { %v457_v23 = vpop.f32.mrf.mxu3  ;;  %v407_v43 = vadd.f32 %v406_v58, %v375_v6 }
  0xa8   :  { %v433_v6 = vadd.f32 %v432_v46, %v407_v43 }
  0xaa   :  { %v458_v60 = vadd.f32 %v457_v23, %v433_v6  ;;  %v673_v23 = vrot.slane %v349_v11, 6 }
  0xac   :  { %v484_v14 = vpop.f32.mrf.mxu0  ;;  %v677_v38 = vsel %vm676_vm1, %v190_v32, %v673_v23  ;;  %v726_v32 = vld [vmem:[%s3534_s3 + $0x150] sm:$0xff] }
  0xad   :  { %v507_v24 = vpop.f32.mrf.mxu1  ;;  %v534_v58 = vpop.f32.mrf.mxu2  ;;  %v485_v46 = vadd.f32 %v484_v14, %v458_v60  ;;  %v19_v14 = vld [vmem:[%s3532_s1] sm:$0xff] }
  0xae   :  { %v565_v44 = vpop.f32.mrf.mxu3 }
  0xaf   :  { %v566_v35 = vadd.f32 %v565_v44, %v534_v58  ;;  %v508_v50 = vadd.f32 %v507_v24, %v485_v46 }
  0xb1   :  { %v674_v6 = vrot.slane %v508_v50, 4  ;;  %v3586_v50 = vand.u32 4294901760, %v2691_v25 }
  0xb4   :  { %v591_v62 = vpop.f32.mrf.mxu0 }
  0xb5   :  { %v592_v43 = vadd.f32 %v591_v62, %v566_v35  ;;  %v616_v15 = vpop.f32.mrf.mxu1  ;;  %v643_v42 = vpop.f32.mrf.mxu2  ;;  %v3578_v35 = vand.u32 4294901760, %v2550_v12 }
  0xb6   :  { %v666_v16 = vpop.f32.mrf.mxu3 }
  0xb7   :  { %v617_v37 = vadd.f32 %v616_v15, %v592_v43  ;;  %v3580_v15 = vand.u32 4294901760, %v2585_v49 }
  0xb9   :  { %v644_v2 = vadd.f32 %v643_v42, %v617_v37  ;;  %v3581_v37 = vand.u32 4294901760, %v2604_v56 }
  0xbb   :  { %v667_v26 = vadd.f32 %v666_v16, %v644_v2 }
  0xbd   :  { %v675_v3 = vrot.slane %v667_v26, 2 }
  0xbf   :  { %v679_v58 = vsel %vm678_vm2, %v674_v6, %v675_v3  ;;  %v724_v3 = vld [vmem:[%s3534_s3 + $0x140] sm:$0xff] }
  0xc0   :  { %v681_v21 = vsel %vm680_vm3, %v677_v38, %v679_v58  ;;  %v3589_v58 = vand.u32 4294901760, %v2763_v40 }
  0xc1   :  { %v683_v51 = vmul.f32 %v681_v21, %v19_v14  ;;  %v3588_v14 = vand.u32 4294901760, %v2744_v33 }
  0xc3   :  { %749 = vst [vmem:[#allocation1] ss:$4 sm:$0xff] %v683_v51  ;;  %v2968_v51 = vand.u32 4294901760, %v724_v3 }
  0xca   :  { %v750_v22 = vld.sshfl [vmem:[#allocation1] sm:$0xff pattern:$0x73625140]  ;;  %v751_v42 = vld.sshfl [vmem:[#allocation1 + $0x8] sm:$0xff pattern:$0x73625140] }
  0xcb   :  { %v790_v24 = vand.u32 4294901760, %v750_v22  ;;  %v2833_v44 = vand.u32 4294901760, %v751_v42 }
  0xcd   :  { %896 = vmatmul.f32.vlgmr.msra.gmra.mxu1 %v790_v24  ;;  %v791_v36 = vsub.f32 %v750_v22, %v790_v24  ;;  %v2836_v0 = vsub.f32 %v751_v42, %v2833_v44  ;;  %v723_v22 = vld [vmem:[%s3534_s3 + $0x138] sm:$0xff] }
  0xce   :  { %1296 = vmatpush.msra.mxu1 %v2538_v54 }
  0xcf   :  { %950 = vmatmul.f32.vlgmr.msra.gmra.mxu2 %v791_v36  ;;  %v792_v60 = vand.u32 4294901760, %v791_v36  ;;  %v1133_v28 = vand.u32 4294901760, %v2836_v0 }
  0xd0   :  { %1298 = vmatpush.msra.mxu1 %v2552_v13  ;;  %1337 = vmatpush.msra.mxu2 %v3578_v35  ;;  %v2993_v35 = vand.u32 4294901760, %v723_v22 }
  0xd1   :  { %989 = vmatmul.f32.vlgmr.msra.gmra.mxu3 %v792_v60  ;;  %v793_v62 = vsub.f32 %v791_v36, %v792_v60  ;;  %v1134_v46 = vsub.f32 %v2836_v0, %v1133_v28 }
  0xd2   :  { %1300 = vmatpush.msra.mxu1 %v2563_v61  ;;  %1341 = vmatpush.msra.mxu2 %v3579_v8  ;;  %v3002_v8 = vsub.f32 %v724_v3, %v2968_v51 }
  0xd3   :  { %1404 = vmatpush.msra.mxu3 %v2538_v54  ;;  %v794_v43 = vand.u32 4294901760, %v793_v62  ;;  %v1135_v11 = vand.u32 4294901760, %v1134_v46  ;;  %v3582_v54 = vand.u32 4294901760, %v2618_v59  ;;  %v3591_v46 = vand.u32 4294901760, %v2807_v19 }
  0xd4   :  { %1302 = vmatpush.msra.mxu1 %v2582_v47  ;;  %1345 = vmatpush.msra.mxu2 %v3580_v15 }
  0xd5   :  { %1406 = vmatpush.msra.mxu3 %v2552_v13  ;;  %795 = vmatmul.f32.vlgmr.msra.gmra.mxu0 %v794_v43  ;;  %v3583_v13 = vand.u32 4294901760, %v2634_v63 }
  0xd6   :  { %1095 = vmatmul.f32.vlgmr.msrb.gmra.mxu1 %v790_v24  ;;  %1243 = vmatpush.msra.mxu0 %v2550_v12  ;;  %v731_v12 = vld [vmem:[%s3534_s3 + $0x178] sm:$0xff] }
  0xd7   :  { %1304 = vmatpush.msra.mxu1 %v2600_v5  ;;  %1349 = vmatpush.msra.mxu2 %v3581_v37 }
  0xd8   :  { %1408 = vmatpush.msra.mxu3 %v2563_v61  ;;  %1136 = vmatmul.f32.vlgmr.msrb.gmra.mxu2 %v1135_v11  ;;  %v730_v61 = vld [vmem:[%s3534_s3 + $0x170] sm:$0xff] }
  0xd9   :  { %1246 = vmatpush.msra.mxu0 %v2566_v29  ;;  %1306 = vmatpush.msra.mxu1 %v2615_v18  ;;  %v2877_v29 = vand.u32 4294901760, %v731_v12  ;;  %v2886_v16 = vand.u32 4294901760, %v730_v61 }
  0xda   :  { %1353 = vmatpush.msra.mxu2 %v3582_v54  ;;  %1410 = vmatpush.msra.mxu3 %v2582_v47  ;;  %v3584_v47 = vand.u32 4294901760, %v2657_v30 }
  0xdb   :  { %1237 = vmatmul.f32.vlgmr.msrb.gmra.mxu3 %v2833_v44  ;;  %1249 = vmatpush.msra.mxu0 %v2585_v49  ;;  %v729_v49 = vld [vmem:[%s3534_s3 + $0x168] sm:$0xff]  ;;  %v2897_v31 = vsub.f32 %v731_v12, %v2877_v29  ;;  %v3560_v12 = vand.u32 4294901760, %v3002_v8 }
  0xdc   :  { %1308 = vmatpush.msra.mxu1 %v2631_v53  ;;  %1357 = vmatpush.msra.mxu2 %v3583_v13  ;;  %v719_v13 = vld [vmem:[%s3534_s3 + $0x118] sm:$0xff] }
  0xdd   :  { %1412 = vmatpush.msra.mxu3 %v2600_v5  ;;  %1252 = vmatpush.msra.mxu0 %v2604_v56  ;;  %v728_v5 = vld [vmem:[%s3534_s3 + $0x160] sm:$0xff]  ;;  %v3585_v56 = vand.u32 4294901760, %v2676_v20  ;;  %v3569_v23 = vand.u32 4294901760, %v2897_v31 }
  0xde   :  { %1310 = vmatpush.msra.mxu1 %v2654_v17  ;;  %1361 = vmatpush.msra.mxu2 %v3584_v47  ;;  %v2912_v2 = vand.u32 4294901760, %v728_v5 }
  0xdf   :  { %1414 = vmatpush.msra.mxu3 %v2615_v18  ;;  %1058 = vmatmul.f32.vlgmr.msrb.gmra.mxu0 %v790_v24  ;;  %v2899_v18 = vand.u32 4294901760, %v729_v49 }
  0xe0   :  { %1255 = vmatpush.msra.mxu0 %v2618_v59  ;;  %1312 = vmatpush.msra.mxu1 %v2673_v10  ;;  %v727_v59 = vld [vmem:[%s3534_s3 + $0x158] sm:$0xff]  ;;  %v2938_v6 = vsub.f32 %v728_v5, %v2912_v2 }
  0xe1   :  { %1365 = vmatpush.msra.mxu2 %v3585_v56  ;;  %1416 = vmatpush.msra.mxu3 %v2631_v53  ;;  %v2910_v53 = vsub.f32 %v730_v61, %v2886_v16  ;;  %v2921_v26 = vsub.f32 %v729_v49, %v2899_v18 }
  0xe2   :  { %1258 = vmatpush.msra.mxu0 %v2634_v63  ;;  %1314 = vmatpush.msra.mxu1 %v2684_v9  ;;  %v3587_v63 = vand.u32 4294901760, %v2702_v39  ;;  %v3565_v21 = vand.u32 4294901760, %v2938_v6 }
  0xe3   :  { %1369 = vmatpush.msra.mxu2 %v3586_v50  ;;  %1418 = vmatpush.msra.mxu3 %v2654_v17  ;;  %v2923_v17 = vand.u32 4294901760, %v727_v59  ;;  %v717_v50 = vld [vmem:[%s3534_s3 + $0x108] sm:$0xff] }
  0xe4   :  { %1261 = vmatpush.msra.mxu0 %v2657_v30  ;;  %1316 = vmatpush.msra.mxu1 %v2699_v41  ;;  %v725_v30 = vld [vmem:[%s3534_s3 + $0x148] sm:$0xff]  ;;  %v1502_v62 = vsub.f32 %v2938_v6, %v3565_v21 }
  0xe5   :  { %1373 = vmatpush.msra.mxu2 %v3587_v63  ;;  %1420 = vmatpush.msra.mxu3 %v2673_v10  ;;  %v3567_v10 = vand.u32 4294901760, %v2910_v53  ;;  %v2957_v38 = vand.u32 4294901760, %v725_v30 }
  0xe6   :  { %1264 = vmatpush.msra.mxu0 %v2676_v20  ;;  %1318 = vmatpush.msra.mxu1 %v2720_v27  ;;  %v2942_v20 = vand.u32 4294901760, %v726_v32  ;;  %v1503_v54 = vand.u32 4294901760, %v1502_v62 }
  0xe7   :  { %1377 = vmatpush.msra.mxu2 %v1202_v55  ;;  %1422 = vmatpush.msra.mxu3 %v2684_v9  ;;  %v1484_v9 = vsub.f32 %v2897_v31, %v3569_v23  ;;  %v3566_v55 = vand.u32 4294901760, %v2921_v26  ;;  %v2986_v60 = vsub.f32 %v725_v30, %v2957_v38 }
  0xe8   :  { %1267 = vmatpush.msra.mxu0 %v2691_v25  ;;  %1320 = vmatpush.msra.mxu1 %v2741_v1  ;;  %v2955_v25 = vsub.f32 %v727_v59, %v2923_v17  ;;  %v1526_v59 = vsub.f32 %v3002_v8, %v3560_v12 }
  0xe9   :  { %1381 = vmatpush.msra.mxu2 %v3588_v14  ;;  %1424 = vmatpush.msra.mxu3 %v2699_v41  ;;  %v1490_v41 = vsub.f32 %v2910_v53, %v3567_v10  ;;  %v1485_v42 = vand.u32 4294901760, %v1484_v9  ;;  %v1496_v24 = vsub.f32 %v2921_v26, %v3566_v55  ;;  %v3561_v11 = vand.u32 4294901760, %v2986_v60  ;;  %v716_v14 = vld [vmem:[%s3534_s3 + $0x100] sm:$0xff] }
  0xea   :  { %1270 = vmatpush.msra.mxu0 %v2702_v39  ;;  %1322 = vmatpush.msra.mxu1 %v2757_v48  ;;  %v2976_v39 = vsub.f32 %v726_v32, %v2942_v20  ;;  %v3564_v36 = vand.u32 4294901760, %v2955_v25 }
  0xeb   :  { %1385 = vmatpush.msra.mxu2 %v3589_v58  ;;  %1426 = vmatpush.msra.mxu3 %v2720_v27  ;;  %v3590_v27 = vand.u32 4294901760, %v2775_v45  ;;  %v1497_v43 = vand.u32 4294901760, %v1496_v24  ;;  %v1520_v5 = vsub.f32 %v2986_v60, %v3561_v11  ;;  %v3099_v24 = vand.u32 4294901760, %v716_v14 }
  0xec   :  { %1273 = vmatpush.msra.mxu0 %v2723_v52  ;;  %1324 = vmatpush.msra.mxu1 %v2772_v7  ;;  %v722_v52 = vld [vmem:[%s3534_s3 + $0x130] sm:$0xff]  ;;  %v1508_v15 = vsub.f32 %v2955_v25, %v3564_v36 }
  0xed   :  { %1389 = vmatpush.msra.mxu2 %v3590_v27  ;;  %1428 = vmatpush.msra.mxu3 %v2741_v1  ;;  %v1491_v1 = vand.u32 4294901760, %v1490_v41  ;;  %v1521_v3 = vand.u32 4294901760, %v1520_v5  ;;  %v746_v5 = vld [vmem:[%s3534_s3 + $0x1f0] sm:$0xff] }
  0xee   :  { %1276 = vmatpush.msra.mxu0 %v2744_v33  ;;  %1326 = vmatpush.msra.mxu1 %v2792_v34  ;;  %v721_v33 = vld [vmem:[%s3534_s3 + $0x128] sm:$0xff]  ;;  %v1509_v49 = vand.u32 4294901760, %v1508_v15 }
  0xef   :  { %1393 = vmatpush.msra.mxu2 %v1226_v57  ;;  %1430 = vmatpush.msra.mxu3 %v2757_v48  ;;  %v3562_v57 = vand.u32 4294901760, %v2976_v39  ;;  %v3011_v48 = vand.u32 4294901760, %v722_v52  ;;  %v3027_v37 = vand.u32 4294901760, %v721_v33 }
  0xf0   :  { %1330 = vmatmul.f32.vlgmr.msra.gmra.mxu1 %v1133_v28  ;;  %1279 = vmatpush.msra.mxu0 %v2763_v40  ;;  %v720_v28 = vld [vmem:[%s3534_s3 + $0x120] sm:$0xff]  ;;  %v3025_v40 = vsub.f32 %v723_v22, %v2993_v35  ;;  %v1527_v22 = vand.u32 4294901760, %v1526_v59 }
  0xf1   :  { %1486 = vmatpush.msrb.mxu1 %v1485_v42  ;;  %1397 = vmatpush.msra.mxu2 %v3591_v46  ;;  %v3040_v61 = vsub.f32 %v722_v52, %v3011_v48  ;;  %v3042_v47 = vand.u32 4294901760, %v720_v28  ;;  %v3055_v56 = vsub.f32 %v721_v33, %v3027_v37 }
  0xf2   :  { %1432 = vmatpush.msra.mxu3 %v2772_v7  ;;  %1399 = vmatmul.f32.vlgmr.msra.gmra.mxu2 %v2833_v44  ;;  %v1514_v7 = vsub.f32 %v2976_v39, %v3562_v57 }
  0xf3   :  { %1492 = vmatpush.msrb.mxu1 %v1491_v1  ;;  %1584 = vmatpush.msrb.mxu2 %v2897_v31  ;;  %v3558_v32 = vand.u32 4294901760, %v3040_v61  ;;  %v3070_v30 = vsub.f32 %v720_v28, %v3042_v47  ;;  %v3556_v58 = vand.u32 4294901760, %v3055_v56  ;;  %v3119_v28 = vsub.f32 %v716_v14, %v3099_v24 }
  0xf4   :  { %1282 = vmatpush.msra.mxu0 %v2775_v45  ;;  %1434 = vmatpush.msra.mxu3 %v2792_v34  ;;  %v718_v45 = vld [vmem:[%s3534_s3 + $0x110] sm:$0xff]  ;;  %v3559_v34 = vand.u32 4294901760, %v3025_v40  ;;  %v1515_v63 = vand.u32 4294901760, %v1514_v7 }
  0xf5   :  { %1436 = vmatmul.f32.vlgmr.msra.gmra.mxu3 %v2833_v44  ;;  %1498 = vmatpush.msrb.mxu1 %v1497_v43  ;;  %v3057_v44 = vand.u32 4294901760, %v719_v13  ;;  %v3555_v27 = vand.u32 4294901760, %v3070_v30  ;;  %v1544_v1 = vsub.f32 %v3055_v56, %v3556_v58  ;;  %v740_v58 = vld [vmem:[%s3534_s3 + $0x1c0] sm:$0xff] }
  0xf6   :  { %1587 = vmatpush.msrb.mxu2 %v2910_v53  ;;  %1637 = vmatpush.msrb.mxu3 %v2877_v29  ;;  %v1532_v9 = vsub.f32 %v3025_v40, %v3559_v34  ;;  %v739_v34 = vld [vmem:[%s3534_s3 + $0x1b8] sm:$0xff]  ;;  %v3237_v11 = vand.u32 4294901760, %v740_v58 }
  0xf7   :  { %1285 = vmatpush.msra.mxu0 %v2799_v4  ;;  %1504 = vmatpush.msrb.mxu1 %v1503_v54  ;;  %v3072_v4 = vand.u32 4294901760, %v718_v45  ;;  %v3085_v41 = vsub.f32 %v719_v13, %v3057_v44  ;;  %v1550_v43 = vsub.f32 %v3070_v30, %v3555_v27  ;;  %v747_v54 = vld [vmem:[%s3534_s3 + $0x1f8] sm:$0xff]  ;;  %v1545_v13 = vand.u32 4294901760, %v1544_v1 }
  0xf8   :  { %1590 = vmatpush.msrb.mxu2 %v2921_v26  ;;  %1639 = vmatpush.msrb.mxu3 %v2886_v16  ;;  %v1533_v52 = vand.u32 4294901760, %v1532_v9  ;;  %v3149_v9 = vand.u32 4294901760, %v746_v5  ;;  %v3252_v21 = vand.u32 4294901760, %v739_v34 }
  0xf9   :  { %1288 = vmatpush.msra.mxu0 %v2807_v19  ;;  %1510 = vmatpush.msrb.mxu1 %v1509_v49  ;;  %v3087_v19 = vand.u32 4294901760, %v717_v50  ;;  %v3097_v42 = vsub.f32 %v718_v45, %v3072_v4  ;;  %v3554_v62 = vand.u32 4294901760, %v3085_v41  ;;  %v1551_v45 = vand.u32 4294901760, %v1550_v43  ;;  %v744_v43 = vld [vmem:[%s3534_s3 + $0x1e0] sm:$0xff] }
  0xfa   :  { %1291 = vmatmul.f32.vlgmr.msra.gmra.mxu0 %v2836_v0  ;;  %1593 = vmatpush.msrb.mxu2 %v2938_v6  ;;  %v1538_v0 = vsub.f32 %v3040_v61, %v3558_v32 }
  0xfb   :  { %1441 = vmatpush.msrb.mxu0 %v2877_v29  ;;  %1641 = vmatpush.msrb.mxu3 %v2899_v18  ;;  %v3109_v33 = vsub.f32 %v717_v50, %v3087_v19  ;;  %v3553_v15 = vand.u32 4294901760, %v3097_v42  ;;  %v1556_v7 = vsub.f32 %v3085_v41, %v3554_v62  ;;  %v3551_v50 = vand.u32 4294901760, %v3119_v28 }
  0xfc   :  { %1516 = vmatpush.msrb.mxu1 %v1515_v63  ;;  %1596 = vmatpush.msrb.mxu2 %v2955_v25  ;;  %v1539_v46 = vand.u32 4294901760, %v1538_v0  ;;  %v3141_v63 = vand.u32 4294901760, %v747_v54  ;;  %v752_v0 = vld.sshfl [vmem:[#allocation1 + $0x10] sm:$0xff pattern:$0x73625140] }
  0xfd   :  { %1443 = vmatpush.msrb.mxu0 %v2886_v16  ;;  %1643 = vmatpush.msrb.mxu3 %v2912_v2  ;;  %v3552_v49 = vand.u32 4294901760, %v3109_v33  ;;  %v1562_v59 = vsub.f32 %v3097_v42, %v3553_v15  ;;  %v1574_v1 = vsub.f32 %v3119_v28, %v3551_v50  ;;  %v3181_v50 = vand.u32 4294901760, %v744_v43 }
  0xfe   :  { %1522 = vmatpush.msrb.mxu1 %v1521_v3  ;;  %1599 = vmatpush.msrb.mxu2 %v2976_v39  ;;  %v1557_v3 = vand.u32 4294901760, %v1556_v7  ;;  %v743_v7 = vld [vmem:[%s3534_s3 + $0x1d8] sm:$0xff] }
  0xff   :  { %1445 = vmatpush.msrb.mxu0 %v2899_v18  ;;  %1645 = vmatpush.msrb.mxu3 %v2923_v17  ;;  %v1568_v14 = vsub.f32 %v3109_v33, %v3552_v49  ;;  %v742_v49 = vld [vmem:[%s3534_s3 + $0x1d0] sm:$0xff]  ;;  %v3188_v15 = vand.u32 4294901760, %v743_v7 }
 0x100   :  { %1528 = vmatpush.msrb.mxu1 %v1527_v22  ;;  %1602 = vmatpush.msrb.mxu2 %v2986_v60  ;;  %v745_v22 = vld [vmem:[%s3534_s3 + $0x1e8] sm:$0xff]  ;;  %v3198_v27 = vand.u32 4294901760, %v742_v49 }
 0x101   :  { %1447 = vmatpush.msrb.mxu0 %v2912_v2  ;;  %1647 = vmatpush.msrb.mxu3 %v2942_v20 }
 0x102   :  { %1534 = vmatpush.msrb.mxu1 %v1533_v52  ;;  %1605 = vmatpush.msrb.mxu2 %v3002_v8  ;;  %v1563_v52 = vand.u32 4294901760, %v1562_v59  ;;  %v3177_v59 = vsub.f32 %v746_v5, %v3149_v9  ;;  %v3229_v32 = vsub.f32 %v742_v49, %v3198_v27  ;;  %v738_v49 = vld [vmem:[%s3534_s3 + $0x1b0] sm:$0xff] }
 0x103   :  { %1449 = vmatpush.msrb.mxu0 %v2923_v17  ;;  %1649 = vmatpush.msrb.mxu3 %v2957_v38  ;;  %v3267_v23 = vand.u32 4294901760, %v738_v49 }
 0x104   :  { %1540 = vmatpush.msrb.mxu1 %v1539_v46  ;;  %1608 = vmatpush.msrb.mxu2 %v3025_v40  ;;  %v3161_v46 = vsub.f32 %v747_v54, %v3141_v63  ;;  %v3174_v54 = vand.u32 4294901760, %v752_v0  ;;  %3592 = vst [vmem:[#allocation5_spill] sm:$0xff] %v3229_v32  ;;  %v3572_v10 = vand.u32 4294901760, %v3229_v32 }
 0x105   :  { %1451 = vmatpush.msrb.mxu0 %v2942_v20  ;;  %1651 = vmatpush.msrb.mxu3 %v2968_v51 }
 0x106   :  { %1546 = vmatpush.msrb.mxu1 %v1545_v13  ;;  %1611 = vmatpush.msrb.mxu2 %v3040_v61  ;;  %v3168_v13 = vand.u32 4294901760, %v745_v22  ;;  %v1473_v62 = vsub.f32 %v752_v0, %v3174_v54 }
 0x107   :  { %1453 = vmatpush.msrb.mxu0 %v2957_v38  ;;  %1653 = vmatpush.msrb.mxu3 %v2993_v35 }
 0x108   :  { %1552 = vmatpush.msrb.mxu1 %v1551_v45  ;;  %1614 = vmatpush.msrb.mxu2 %v3055_v56  ;;  %v1569_v45 = vand.u32 4294901760, %v1568_v14  ;;  %v3557_v14 = vand.u32 4294901760, %v3161_v46  ;;  %v3193_v5 = vsub.f32 %v745_v22, %v3168_v13  ;;  %v3206_v22 = vsub.f32 %v744_v43, %v3181_v50 }
 0x109   :  { %1455 = vmatpush.msrb.mxu0 %v2968_v51  ;;  %1655 = vmatpush.msrb.mxu3 %v3011_v48 }
 0x10a   :  { %1558 = vmatpush.msrb.mxu1 %v1557_v3  ;;  %1617 = vmatpush.msrb.mxu2 %v3070_v30  ;;  %v1575_v3 = vand.u32 4294901760, %v1574_v1  ;;  %v741_v1 = vld [vmem:[%s3534_s3 + $0x1c8] sm:$0xff]  ;;  %v1825_v0 = vsub.f32 %v3161_v46, %v3557_v14  ;;  %v3568_v43 = vand.u32 4294901760, %v3193_v5  ;;  %v1474_v14 = vand.u32 4294901760, %v1473_v62 }
 0x10b   :  { %1457 = vmatpush.msrb.mxu0 %v2993_v35  ;;  %1657 = vmatpush.msrb.mxu3 %v3027_v37  ;;  %v3570_v12 = vand.u32 4294901760, %v3206_v22 }
 0x10c   :  { %1564 = vmatpush.msrb.mxu1 %v1563_v52  ;;  %1620 = vmatpush.msrb.mxu2 %v3085_v41  ;;  %v3563_v52 = vand.u32 4294901760, %v3177_v59  ;;  %v1826_v57 = vand.u32 4294901760, %v1825_v0  ;;  %v1475_v55 = vsub.f32 %v1473_v62, %v1474_v14 }
 0x10d   :  { %1459 = vmatpush.msrb.mxu0 %v3011_v48  ;;  %1659 = vmatpush.msrb.mxu3 %v3042_v47 }
 0x10e   :  { %1570 = vmatpush.msrb.mxu1 %v1569_v45  ;;  %1623 = vmatpush.msrb.mxu2 %v3097_v42  ;;  %v3213_v45 = vsub.f32 %v743_v7, %v3188_v15  ;;  %v1831_v7 = vsub.f32 %v3177_v59, %v3563_v52 }
 0x10f   :  { %1461 = vmatpush.msrb.mxu0 %v3027_v37  ;;  %1661 = vmatpush.msrb.mxu3 %v3057_v44 }
 0x110   :  { %1576 = vmatpush.msrb.mxu1 %v1575_v3  ;;  %1626 = vmatpush.msrb.mxu2 %v3109_v33  ;;  %v3221_v3 = vand.u32 4294901760, %v741_v1  ;;  %v3571_v52 = vand.u32 4294901760, %v3213_v45  ;;  %v1832_v0 = vand.u32 4294901760, %v1831_v7  ;;  %v3280_v7 = vsub.f32 %v739_v34, %v3252_v21 }
 0x111   :  { %1463 = vmatpush.msrb.mxu0 %v3042_v47  ;;  %1663 = vmatpush.msrb.mxu3 %v3072_v4 }
 0x112   :  { %1578 = vmatmul.f32.vlgmr.msrb.gmra.mxu1 %v3174_v54  ;;  %1629 = vmatpush.msrb.mxu2 %v3119_v28  ;;  %v3250_v36 = vsub.f32 %v741_v1, %v3221_v3  ;;  %v1843_v1 = vsub.f32 %v3206_v22, %v3570_v12  ;;  %3593 = vst [vmem:[#allocation6_spill] sm:$0xff] %v3280_v7 }
 0x113   :  { %1745 = vmatpush.msra.mxu1 %v2877_v29  ;;  %1465 = vmatpush.msrb.mxu0 %v3057_v44  ;;  %v1837_v29 = vsub.f32 %v3193_v5, %v3568_v43  ;;  %v3265_v43 = vsub.f32 %v740_v58, %v3237_v11  ;;  %v3295_v58 = vsub.f32 %v738_v49, %v3267_v23 }
 0x114   :  { %1665 = vmatpush.msrb.mxu3 %v3087_v19  ;;  %1632 = vmatmul.f32.vlgmr.msrb.gmra.mxu2 %v1473_v62  ;;  %v1849_v62 = vsub.f32 %v3213_v45, %v3571_v52  ;;  %v1855_v52 = vsub.f32 %v3229_v32, %v3572_v10  ;;  %v1844_v34 = vand.u32 4294901760, %v1843_v1  ;;  %v734_v10 = vld [vmem:[%s3534_s3 + $0x190] sm:$0xff]  ;;  %v3594_v32 = vand.u32 4294901760, %v2897_v31 }
 0x115   :  { %1747 = vmatpush.msra.mxu1 %v2886_v16  ;;  %1782 = vmatpush.msra.mxu2 %v3141_v63  ;;  %v737_v16 = vld [vmem:[%s3534_s3 + $0x1a8] sm:$0xff]  ;;  %v3596_v31 = vand.u32 4294901760, %v2910_v53  ;;  %v3325_v49 = vand.u32 4294901760, %v734_v10  ;;  %v3598_v53 = vand.u32 4294901760, %v2921_v26 }
 0x116   :  { %1467 = vmatpush.msrb.mxu0 %v3072_v4  ;;  %1667 = vmatpush.msrb.mxu3 %v3099_v24  ;;  %v3282_v12 = vand.u32 4294901760, %v737_v16 }
 0x117   :  { %1671 = vmatmul.f32.vlgmr.msrb.gmra.mxu3 %v1474_v14  ;;  %1749 = vmatpush.msra.mxu1 %v2899_v18  ;;  %v736_v18 = vld [vmem:[%s3534_s3 + $0x1a0] sm:$0xff]  ;;  %v1838_v14 = vand.u32 4294901760, %v1837_v29 }
 0x118   :  { %1784 = vmatpush.msra.mxu2 %v3149_v9  ;;  %1827 = vmatpush.msra.mxu3 %v1826_v57  ;;  %v1476_v57 = vand.u32 4294901760, %v1475_v55  ;;  %v1850_v55 = vand.u32 4294901760, %v1849_v62  ;;  %v3310_v29 = vsub.f32 %v737_v16, %v3282_v12  ;;  %v1856_v62 = vand.u32 4294901760, %v1855_v52 }
 0x119   :  { %1469 = vmatpush.msrb.mxu0 %v3087_v19  ;;  %1751 = vmatpush.msra.mxu1 %v2912_v2  ;;  %v735_v2 = vld [vmem:[%s3534_s3 + $0x198] sm:$0xff] }
 0x11a   :  { %1786 = vmatpush.msra.mxu2 %v3168_v13  ;;  %1833 = vmatpush.msra.mxu3 %v1832_v0  ;;  %v3297_v0 = vand.u32 4294901760, %v736_v18 }
 0x11b   :  { %1471 = vmatpush.msrb.mxu0 %v3099_v24  ;;  %1753 = vmatpush.msra.mxu1 %v2923_v17  ;;  %v3595_v17 = vand.u32 4294901760, %v3250_v36 }
 0x11c   :  { %1477 = vmatmul.f32.vlgmr.msrb.gmra.mxu0 %v1476_v57  ;;  %1788 = vmatpush.msra.mxu2 %v3181_v50  ;;  %v3312_v57 = vand.u32 4294901760, %v735_v2  ;;  %v3323_v16 = vsub.f32 %v736_v18, %v3297_v0 }
 0x11d   :  { %1678 = vmatpush.msra.mxu0 %v3594_v32  ;;  %1839 = vmatpush.msra.mxu3 %v1838_v14  ;;  %v1861_v1 = vsub.f32 %v3250_v36, %v3595_v17  ;;  %v3597_v32 = vand.u32 4294901760, %v3265_v43  ;;  %v753_v17 = vld.sshfl [vmem:[#allocation1 + $0x18] sm:$0xff pattern:$0x73625140] }
 0x11e   :  { %1755 = vmatpush.msra.mxu1 %v2942_v20  ;;  %1790 = vmatpush.msra.mxu2 %v3188_v15  ;;  %v733_v20 = vld [vmem:[%s3534_s3 + $0x188] sm:$0xff] }
 0x11f   :  { %1682 = vmatpush.msra.mxu0 %v3596_v31  ;;  %1845 = vmatpush.msra.mxu3 %v1844_v34  ;;  %v1867_v14 = vsub.f32 %v3265_v43, %v3597_v32  ;;  %v1862_v52 = vand.u32 4294901760, %v1861_v1  ;;  %v3599_v34 = vand.u32 4294901760, %v3280_v7  ;;  %v3339_v32 = vsub.f32 %v735_v2, %v3312_v57 }
 0x120   :  { %1757 = vmatpush.msra.mxu1 %v2957_v38  ;;  %1792 = vmatpush.msra.mxu2 %v3198_v27  ;;  %v732_v38 = vld [vmem:[%s3534_s3 + $0x180] sm:$0xff]  ;;  %v3346_v26 = vand.u32 4294901760, %v733_v20  ;;  %v3355_v31 = vsub.f32 %v734_v10, %v3325_v49 }
 0x121   :  { %1686 = vmatpush.msra.mxu0 %v3598_v53  ;;  %1851 = vmatpush.msra.mxu3 %v1850_v55  ;;  %v1873_v18 = vsub.f32 %v3280_v7, %v3599_v34  ;;  %v3600_v55 = vand.u32 4294901760, %v2938_v6  ;;  %v1868_v1 = vand.u32 4294901760, %v1867_v14  ;;  %v3601_v53 = vand.u32 4294901760, %v3295_v58 }
 0x122   :  { %1759 = vmatpush.msra.mxu1 %v2968_v51  ;;  %1794 = vmatpush.msra.mxu2 %v3221_v3  ;;  %v1890_v34 = vand.u32 4294901760, %v3323_v16  ;;  %v3359_v51 = vand.u32 4294901760, %v732_v38  ;;  %v3361_v7 = vand.u32 4294901760, %v753_v17  ;;  %v3602_v6 = vand.u32 4294901760, %v2955_v25 }
 0x123   :  { %1690 = vmatpush.msra.mxu0 %v3600_v55  ;;  %1857 = vmatpush.msra.mxu3 %v1856_v62  ;;  %v1879_v2 = vsub.f32 %v3295_v58, %v3601_v53  ;;  %v1874_v62 = vand.u32 4294901760, %v1873_v18  ;;  %v3603_v14 = vand.u32 4294901760, %v3310_v29  ;;  %v1896_v10 = vand.u32 4294901760, %v3339_v32 }
 0x124   :  { %1761 = vmatpush.msra.mxu1 %v2993_v35  ;;  %1796 = vmatpush.msra.mxu2 %v3237_v11  ;;  %v3372_v35 = vsub.f32 %v733_v20, %v3346_v26  ;;  %v3604_v53 = vand.u32 4294901760, %v2976_v39  ;;  %v1902_v18 = vand.u32 4294901760, %v3355_v31  ;;  %v3386_v20 = vsub.f32 %v732_v38, %v3359_v51 }
 0x125   :  { %1694 = vmatpush.msra.mxu0 %v3602_v6  ;;  %1863 = vmatpush.msra.mxu3 %v1862_v52  ;;  %v1885_v55 = vsub.f32 %v3310_v29, %v3603_v14  ;;  %v1880_v25 = vand.u32 4294901760, %v1879_v2  ;;  %v1891_v52 = vsub.f32 %v3323_v16, %v1890_v34  ;;  %v3605_v39 = vand.u32 4294901760, %v2986_v60 }
 0x126   :  { %1763 = vmatpush.msra.mxu1 %v3011_v48  ;;  %1798 = vmatpush.msra.mxu2 %v3252_v21  ;;  %v3383_v48 = vsub.f32 %v753_v17, %v3361_v7  ;;  %v1897_v2 = vsub.f32 %v3339_v32, %v1896_v10  ;;  %v3606_v17 = vand.u32 4294901760, %v3002_v8  ;;  %v1903_v60 = vsub.f32 %v3355_v31, %v1902_v18 }
 0x127   :  { %1698 = vmatpush.msra.mxu0 %v3604_v53  ;;  %1869 = vmatpush.msra.mxu3 %v1868_v1  ;;  %v1886_v1 = vand.u32 4294901760, %v1885_v55  ;;  %v1892_v38 = vand.u32 4294901760, %v1891_v52  ;;  %v3609_v53 = vand.u32 4294901760, %v3055_v56  ;;  %v3611_v56 = vand.u32 4294901760, %v3085_v41 }
 0x128   :  { %1765 = vmatpush.msra.mxu1 %v3027_v37  ;;  %1800 = vmatpush.msra.mxu2 %v3267_v23  ;;  %v1908_v37 = vand.u32 4294901760, %v3372_v35  ;;  %v1815_v6 = vand.u32 4294901760, %v3383_v48  ;;  %v1898_v8 = vand.u32 4294901760, %v1897_v2  ;;  %v1904_v55 = vand.u32 4294901760, %v1903_v60 }
 0x129   :  { %1702 = vmatpush.msra.mxu0 %v3605_v39  ;;  %1875 = vmatpush.msra.mxu3 %v1874_v62  ;;  %v3607_v62 = vand.u32 4294901760, %v3025_v40  ;;  %v3614_v39 = vand.u32 4294901760, %v3177_v59  ;;  %v3615_v41 = vand.u32 4294901760, %v3109_v33  ;;  %v3618_v2 = vand.u32 4294901760, %v3206_v22 }
 0x12a   :  { %1767 = vmatpush.msra.mxu1 %v3042_v47  ;;  %1802 = vmatpush.msra.mxu2 %v3282_v12  ;;  %v1914_v47 = vand.u32 4294901760, %v3386_v20  ;;  %v1909_v14 = vsub.f32 %v3372_v35, %v1908_v37  ;;  %v1816_v40 = vsub.f32 %v3383_v48, %v1815_v6  ;;  %v3619_v33 = vand.u32 4294901760, %v3213_v45 }
 0x12b   :  { %1706 = vmatpush.msra.mxu0 %v3606_v17  ;;  %1881 = vmatpush.msra.mxu3 %v1880_v25 }
 0x12c   :  { %1769 = vmatpush.msra.mxu1 %v3057_v44  ;;  %1804 = vmatpush.msra.mxu2 %v3297_v0  ;;  %v3608_v44 = vand.u32 4294901760, %v3040_v61  ;;  %v1910_v61 = vand.u32 4294901760, %v1909_v14  ;;  %v1817_v25 = vand.u32 4294901760, %v1816_v40 }
 0x12d   :  { %1710 = vmatpush.msra.mxu0 %v3607_v62  ;;  %1887 = vmatpush.msra.mxu3 %v1886_v1  ;;  %v3616_v1 = vand.u32 4294901760, %v3193_v5 }
 0x12e   :  { %1771 = vmatpush.msra.mxu1 %v3072_v4  ;;  %1806 = vmatpush.msra.mxu2 %v3312_v57  ;;  %v1915_v4 = vsub.f32 %v3386_v20, %v1914_v47 }
 0x12f   :  { %1714 = vmatpush.msra.mxu0 %v3608_v44  ;;  %1893 = vmatpush.msra.mxu3 %v1892_v38 }
 0x130   :  { %1773 = vmatpush.msra.mxu1 %v3087_v19  ;;  %1808 = vmatpush.msra.mxu2 %v3325_v49  ;;  %v3610_v19 = vand.u32 4294901760, %v3070_v30  ;;  %v1916_v52 = vand.u32 4294901760, %v1915_v4  ;;  %v3613_v30 = vand.u32 4294901760, %v3097_v42  ;;  %v3617_v42 = vand.u32 4294901760, %v3119_v28  ;;  %v3620_v28 = vld [vmem:[#allocation5_spill] sm:$0xff] }
 0x131   :  { %1718 = vmatpush.msra.mxu0 %v3609_v53  ;;  %1899 = vmatpush.msra.mxu3 %v1898_v8 }
 0x132   :  { %1775 = vmatpush.msra.mxu1 %v3099_v24  ;;  %1810 = vmatpush.msra.mxu2 %v3346_v26  ;;  %v3612_v24 = vand.u32 4294901760, %v3161_v46 }
 0x133   :  { %1722 = vmatpush.msra.mxu0 %v3610_v19  ;;  %1905 = vmatpush.msra.mxu3 %v1904_v55 }
 0x134   :  { %1777 = vmatmul.f32.vlgmr.msra.gmra.mxu1 %v3174_v54  ;;  %1812 = vmatpush.msra.mxu2 %v3359_v51 }
 0x135   :  { %1978 = vmatpush.msrb.mxu1 %v3141_v63  ;;  %1726 = vmatpush.msra.mxu0 %v3611_v56 }
 0x136   :  { %1911 = vmatpush.msra.mxu3 %v1910_v61  ;;  %1818 = vmatmul.f32.vlgmr.msra.gmra.mxu2 %v1817_v25 }
 0x137   :  { %1980 = vmatpush.msrb.mxu1 %v3149_v9  ;;  %2019 = vmatpush.msrb.mxu2 %v3612_v24 }
 0x138   :  { %1730 = vmatpush.msra.mxu0 %v3613_v30  ;;  %1917 = vmatpush.msra.mxu3 %v1916_v52 }
 0x139   :  { %1919 = vmatmul.f32.vlgmr.msra.gmra.mxu3 %v3361_v7  ;;  %1982 = vmatpush.msrb.mxu1 %v3168_v13 }
 0x13a   :  { %2023 = vmatpush.msrb.mxu2 %v3614_v39  ;;  %2086 = vmatpush.msrb.mxu3 %v3141_v63  ;;  %v3621_v63 = vand.u32 4294901760, %v3620_v28 }
 0x13b   :  { %1734 = vmatpush.msra.mxu0 %v3615_v41  ;;  %1984 = vmatpush.msrb.mxu1 %v3181_v50 }
 0x13c   :  { %2027 = vmatpush.msrb.mxu2 %v3616_v1  ;;  %2088 = vmatpush.msrb.mxu3 %v3149_v9  ;;  %v3622_v9 = vand.u32 4294901760, %v3250_v36 }
 0x13d   :  { %1738 = vmatpush.msra.mxu0 %v3617_v42  ;;  %1986 = vmatpush.msrb.mxu1 %v3188_v15 }
 0x13e   :  { %1740 = vmatmul.f32.vlgmr.msra.gmra.mxu0 %v3174_v54  ;;  %2031 = vmatpush.msrb.mxu2 %v3618_v2 }
 0x13f   :  { %1925 = vmatpush.msrb.mxu0 %v3161_v46  ;;  %2090 = vmatpush.msrb.mxu3 %v3168_v13  ;;  %v3627_v13 = vand.u32 4294901760, %v3310_v29 }
 0x140   :  { %1988 = vmatpush.msrb.mxu1 %v3198_v27  ;;  %2035 = vmatpush.msrb.mxu2 %v3619_v33 }
 0x141   :  { %1928 = vmatpush.msrb.mxu0 %v3177_v59  ;;  %2092 = vmatpush.msrb.mxu3 %v3181_v50  ;;  %v3623_v50 = vand.u32 4294901760, %v3265_v43 }
 0x142   :  { %1990 = vmatpush.msrb.mxu1 %v3221_v3  ;;  %2039 = vmatpush.msrb.mxu2 %v3621_v63 }
 0x143   :  { %1931 = vmatpush.msrb.mxu0 %v3193_v5  ;;  %2094 = vmatpush.msrb.mxu3 %v3188_v15  ;;  %v3624_v15 = vld [vmem:[#allocation6_spill] sm:$0xff] }
 0x144   :  { %1992 = vmatpush.msrb.mxu1 %v3237_v11  ;;  %2043 = vmatpush.msrb.mxu2 %v3622_v9  ;;  %v3625_v46 = vand.u32 4294901760, %v3624_v15 }
 0x145   :  { %1934 = vmatpush.msrb.mxu0 %v3206_v22  ;;  %2096 = vmatpush.msrb.mxu3 %v3198_v27  ;;  %v3626_v27 = vand.u32 4294901760, %v3295_v58 }
 0x146   :  { %1994 = vmatpush.msrb.mxu1 %v3252_v21  ;;  %2047 = vmatpush.msrb.mxu2 %v3623_v50 }
 0x147   :  { %1937 = vmatpush.msrb.mxu0 %v3213_v45  ;;  %2098 = vmatpush.msrb.mxu3 %v3221_v3 }
 0x148   :  { %1996 = vmatpush.msrb.mxu1 %v3267_v23  ;;  %2051 = vmatpush.msrb.mxu2 %v3625_v46 }
 0x149   :  { %1940 = vmatpush.msrb.mxu0 %v3620_v28  ;;  %2100 = vmatpush.msrb.mxu3 %v3237_v11 }
 0x14a   :  { %1998 = vmatpush.msrb.mxu1 %v3282_v12  ;;  %2055 = vmatpush.msrb.mxu2 %v3626_v27  ;;  %v897_v11 = vpop.f32.mrf.mxu1 }
 0x14b   :  { %1943 = vmatpush.msrb.mxu0 %v3250_v36  ;;  %2102 = vmatpush.msrb.mxu3 %v3252_v21 }
 0x14c   :  { %2000 = vmatpush.msrb.mxu1 %v3297_v0  ;;  %2059 = vmatpush.msrb.mxu2 %v3627_v13 }
 0x14d   :  { %1946 = vmatpush.msrb.mxu0 %v3265_v43  ;;  %2104 = vmatpush.msrb.mxu3 %v3267_v23  ;;  %v20_v23 = vld [vmem:[%s3532_s1 + $0x8] sm:$0x3]  ;;  %s2167_s1 = smov [#allocation2]  }
 0x14e   :  { %2002 = vmatpush.msrb.mxu1 %v3312_v57  ;;  %2063 = vmatpush.msrb.mxu2 %v1890_v34  ;;  %s2129_s24 = sshll.u32 %s2167_s1, 4  ;;  %s2130_s24 = int_to_ptr.vmem [resolvable:$true] %s2129_s24 }
 0x14f   :  { %1949 = vmatpush.msrb.mxu0 %v3624_v15  ;;  %2106 = vmatpush.msrb.mxu3 %v3282_v12 }
 0x150   :  { %2004 = vmatpush.msrb.mxu1 %v3325_v49  ;;  %2067 = vmatpush.msrb.mxu2 %v1896_v10 }
 0x151   :  { %1952 = vmatpush.msrb.mxu0 %v3295_v58  ;;  %2108 = vmatpush.msrb.mxu3 %v3297_v0 }
 0x152   :  { %2006 = vmatpush.msrb.mxu1 %v3346_v26  ;;  %2071 = vmatpush.msrb.mxu2 %v1902_v18  ;;  %v796_v21 = vpop.f32.mrf.mxu0  ;;  %v951_v54 = vpop.f32.mrf.mxu2 }
 0x153   :  { %1955 = vmatpush.msrb.mxu0 %v3310_v29  ;;  %2110 = vmatpush.msrb.mxu3 %v3312_v57  ;;  %v797_v36 = vadd.f32 %v796_v21, %v20_v23  ;;  %v1096_v3 = vpop.f32.mrf.mxu1 }
 0x154   :  { %2008 = vmatpush.msrb.mxu1 %v3359_v51  ;;  %2075 = vmatpush.msrb.mxu2 %v1908_v37  ;;  %v990_v5 = vpop.f32.mrf.mxu3 }
 0x155   :  { %1958 = vmatpush.msrb.mxu0 %v3323_v16  ;;  %2112 = vmatpush.msrb.mxu3 %v3325_v49  ;;  %v898_v12 = vadd.f32 %v897_v11, %v797_v36 }
 0x156   :  { %2012 = vmatmul.f32.vlgmr.msrb.gmra.mxu1 %v1815_v6  ;;  %2079 = vmatpush.msrb.mxu2 %v1914_v47 }
 0x157   :  { %1961 = vmatpush.msrb.mxu0 %v3339_v32  ;;  %2114 = vmatpush.msrb.mxu3 %v3346_v26  ;;  %v952_v59 = vadd.f32 %v951_v54, %v898_v12 }
 0x158   :  { %2081 = vmatmul.f32.vlgmr.msrb.gmra.mxu2 %v3361_v7 }
 0x159   :  { %1964 = vmatpush.msrb.mxu0 %v3355_v31  ;;  %2116 = vmatpush.msrb.mxu3 %v3359_v51  ;;  %v991_v22 = vadd.f32 %v990_v5, %v952_v59 }
 0x15a   :  { %2118 = vmatmul.f32.vlgmr.msrb.gmra.mxu3 %v3361_v7 }
 0x15b   :  { %1967 = vmatpush.msrb.mxu0 %v3372_v35  ;;  %v1137_v7 = vpop.f32.mrf.mxu2 }
 0x15c   :  { %v1059_v45 = vpop.f32.mrf.mxu0 }
 0x15d   :  { %1970 = vmatpush.msrb.mxu0 %v3386_v20  ;;  %v1060_v43 = vadd.f32 %v1059_v45, %v991_v22 }
 0x15e   :  { %1973 = vmatmul.f32.vlgmr.msrb.gmra.mxu0 %v3383_v48  ;;  %v1238_v0 = vpop.f32.mrf.mxu3 }
 0x15f   :  { %v1097_v58 = vadd.f32 %v1096_v3, %v1060_v43 }
 0x161   :  { %v1138_v29 = vadd.f32 %v1137_v7, %v1097_v58 }
 0x163   :  { %v1239_v57 = vadd.f32 %v1238_v0, %v1138_v29 }
 0x16d   :  { %v1331_v31 = vpop.f32.mrf.mxu1 }
 0x175   :  { %v1400_v26 = vpop.f32.mrf.mxu2 }
 0x177   :  { %v1292_v49 = vpop.f32.mrf.mxu0 }
 0x178   :  { %v1293_v16 = vadd.f32 %v1292_v49, %v1239_v57  ;;  %v1437_v51 = vpop.f32.mrf.mxu3 }
 0x17a   :  { %v1332_v32 = vadd.f32 %v1331_v31, %v1293_v16 }
 0x17c   :  { %v1401_v34 = vadd.f32 %v1400_v26, %v1332_v32 }
 0x17e   :  { %v1438_v35 = vadd.f32 %v1437_v51, %v1401_v34 }
 0x18f   :  { %v1579_v48 = vpop.f32.mrf.mxu1 }
 0x197   :  { %v1633_v37 = vpop.f32.mrf.mxu2 }
 0x199   :  { %v1478_v10 = vpop.f32.mrf.mxu0 }
 0x19a   :  { %v1479_v18 = vadd.f32 %v1478_v10, %v1438_v35  ;;  %v1672_v38 = vpop.f32.mrf.mxu3 }
 0x19c   :  { %v1580_v20 = vadd.f32 %v1579_v48, %v1479_v18 }
 0x19e   :  { %v1634_v17 = vadd.f32 %v1633_v37, %v1580_v20 }
 0x1a0   :  { %v1673_v6 = vadd.f32 %v1672_v38, %v1634_v17 }
 0x1b1   :  { %v1778_v62 = vpop.f32.mrf.mxu1 }
 0x1b9   :  { %v1819_v14 = vpop.f32.mrf.mxu2 }
 0x1bb   :  { %v1741_v60 = vpop.f32.mrf.mxu0 }
 0x1bc   :  { %v1742_v47 = vadd.f32 %v1741_v60, %v1673_v6  ;;  %v1920_v55 = vpop.f32.mrf.mxu3 }
 0x1be   :  { %v1779_v8 = vadd.f32 %v1778_v62, %v1742_v47 }
 0x1c0   :  { %v1820_v44 = vadd.f32 %v1819_v14, %v1779_v8 }
 0x1c2   :  { %v1921_v40 = vadd.f32 %v1920_v55, %v1820_v44 }
 0x1d3   :  { %v2013_v61 = vpop.f32.mrf.mxu1 }
 0x1db   :  { %v1974_v4 = vpop.f32.mrf.mxu0  ;;  %v2082_v25 = vpop.f32.mrf.mxu2 }
 0x1dc   :  { %v1975_v53 = vadd.f32 %v1974_v4, %v1921_v40 }
 0x1dd   :  { %v2119_v56 = vpop.f32.mrf.mxu3 }
 0x1de   :  { %v2014_v19 = vadd.f32 %v2013_v61, %v1975_v53 }
 0x1e0   :  { %v2083_v52 = vadd.f32 %v2082_v25, %v2014_v19 }
 0x1e2   :  { %v2120_v24 = vadd.f32 %v2119_v56, %v2083_v52 }
 0x1e4   :  { %2123 = vst.msk [vmem:[#allocation2] sm:$0x3] %vm2122_vm4, %v2120_v24 }
 0x1e5   :  { %2134 = dma.vmem_to_hbm [thread:$0]  %s2130_s24, 32, %s2132_s26, [#allocation3]  }
 0x1e6   :  { %2165 = dma.done.wait [#allocation3], 32  }
 0x1e7   :  { %2166 = vsyncadd [#allocation3], 4294967264 }
 0x1e8   :  { %2139 = vsyncpa [#allocation3], 1 }

</bundles_post_ra>
